<compile_context>
chip_gen: v5e
topology: v5e:2x2
jax: 0.10.0
libtpu: 0.0.40
codegen_flags: <defaults>
</compile_context>

<pallas_src>
import functools
import math

import jax
import jax.numpy as jnp
import numpy as np
from jax.experimental import pallas as pl
from jax.experimental.pallas import tpu as pltpu

_BF16 = jnp.bfloat16


def _thetas(nlayers, lamda):
    # theta_l = min(1, log(lamda / l + 1)), l = 1..nlayers (static Python floats)
    return [min(1.0, math.log(lamda / (l + 1) + 1.0)) for l in range(nlayers)]


def _vmem_capacity_bytes():
    try:
        cap = int(pltpu.get_tpu_info().vmem_capacity_bytes)
        if cap > 0:
            return cap
    except Exception:
        pass
    return 64 * 2**20  # conservative fallback (v7x per-core VMEM)


# ----------------------------------------------------------------------------
# Fully fused single-call kernel (adj and all weights resident in VMEM).
# ----------------------------------------------------------------------------
def _make_fused_kernel(nlayers, lamda, alpha, variant):
    thetas = _thetas(nlayers, lamda)
    alpha = float(alpha)

    def kernel(x_ref, adj_ref, wfc0_ref, bfc0_ref, wg_ref, wfc1_ref, bfc1_ref,
               out_ref, h0_ref):
        # fcs[0]: Linear(nfeat, nhidden) + ReLU  (bf16 MXU inputs, f32 accumulate)
        h = jnp.dot(x_ref[...], wfc0_ref[...], preferred_element_type=jnp.float32)
        h = jnp.maximum(h + bfc0_ref[...], 0.0)
        # _layers[0] kept as a bf16 VMEM scratch (it is only ever an MXU operand /
        # residual-mix input); re-read each layer instead of held in vregs.
        h0_ref[...] = h.astype(_BF16)

        # GraphConvolution layers (residual=True), statically unrolled.
        for l in range(nlayers):
            theta = thetas[l]
            # spmm(adj, input): read adj right before its use.
            hi = jnp.dot(adj_ref[...], h.astype(_BF16),
                         preferred_element_type=jnp.float32)
            h0 = h0_ref[...]                              # bf16
            if variant:
                # support = cat([hi, h0], 1); one K=2*nhidden MXU contraction
                support = jnp.concatenate([hi.astype(_BF16), h0], axis=-1)
                sw = jnp.dot(support, wg_ref[l],
                             preferred_element_type=jnp.float32)
                r = (1.0 - alpha) * hi + alpha * h0.astype(jnp.float32)
            else:
                s = (1.0 - alpha) * hi + alpha * h0.astype(jnp.float32)
                sw = jnp.dot(s.astype(_BF16), wg_ref[l],
                             preferred_element_type=jnp.float32)
                r = s
            # f32 elementwise combine + ReLU + residual (input)
            h = jnp.maximum(theta * sw + (1.0 - theta) * r + h, 0.0)

        # fcs[-1]: Linear(nhidden, nhidden), no activation.
        o = jnp.dot(h.astype(_BF16), wfc1_ref[...],
                    preferred_element_type=jnp.float32)
        out_ref[...] = o + bfc1_ref[...]

    return kernel


def _fused_forward(x_b, adj_b, prep, *, nlayers, lamda, alpha, variant, vmem_limit):
    N, nfeat = x_b.shape
    nhidden = prep["w_fc0"].shape[1]
    in_f = prep["w_gcn"].shape[1]

    kernel = _make_fused_kernel(nlayers, lamda, alpha, variant)
    inputs = [x_b, adj_b, prep["w_fc0"], prep["b_fc0"], prep["w_gcn"],
              prep["w_fc1"], prep["b_fc1"]]

    in_bytes = sum(int(a.size) * a.dtype.itemsize for a in inputs)
    out_bytes = N * nhidden * 4
    flops = (2 * N * nfeat * nhidden
             + nlayers * (2 * N * N * nhidden + 2 * N * in_f * nhidden)
             + 2 * N * nhidden * nhidden)
    cost = pl.CostEstimate(flops=int(flops), transcendentals=0,
                           bytes_accessed=int(in_bytes + out_bytes))

    vmem_spec = lambda: pl.BlockSpec(memory_space=pltpu.MemorySpace.VMEM)
    return pl.pallas_call(
        kernel,
        out_shape=jax.ShapeDtypeStruct((N, nhidden), jnp.float32),
        in_specs=[vmem_spec() for _ in inputs],
        out_specs=vmem_spec(),
        scratch_shapes=[pltpu.VMEM((N, nhidden), _BF16)],
        compiler_params=pltpu.CompilerParams(vmem_limit_bytes=int(vmem_limit)),
        cost_estimate=cost,
    )(*inputs)


# ----------------------------------------------------------------------------
# Row-tiled per-layer path for large proteins (adj streamed by row tiles).
# ----------------------------------------------------------------------------
def _make_layer_kernel(theta, alpha, variant):
    theta = float(theta)
    alpha = float(alpha)

    def kernel(adj_ref, hfull_ref, hrow_ref, h0_ref, wg_ref, out_ref):
        hi = jnp.dot(adj_ref[...], hfull_ref[...],
                     preferred_element_type=jnp.float32)
        h0 = h0_ref[...]                                  # bf16 row tile
        if variant:
            support = jnp.concatenate([hi.astype(_BF16), h0], axis=-1)
            sw = jnp.dot(support, wg_ref[...], preferred_element_type=jnp.float32)
            r = (1.0 - alpha) * hi + alpha * h0.astype(jnp.float32)
        else:
            s = (1.0 - alpha) * hi + alpha * h0.astype(jnp.float32)
            sw = jnp.dot(s.astype(_BF16), wg_ref[...],
                         preferred_element_type=jnp.float32)
            r = s
        out_ref[...] = jnp.maximum(theta * sw + (1.0 - theta) * r + hrow_ref[...],
                                   0.0)

    return kernel


def _gcn_layer_tiled(adj_b, h_f32, h0_b, wg_l, *, theta, alpha, variant, tm,
                     vmem_limit):
    Np, nh = h_f32.shape
    h_b = h_f32.astype(_BF16)            # one small cast per layer (MXU operand)
    kernel = _make_layer_kernel(theta, alpha, variant)
    return pl.pallas_call(
        kernel,
        out_shape=jax.ShapeDtypeStruct((Np, nh), jnp.float32),
        grid=(Np // tm,),
        in_specs=[
            pl.BlockSpec((tm, Np), lambda i: (i, 0)),    # adj row tile (streamed)
            pl.BlockSpec((Np, nh), lambda i: (0, 0)),    # full h (bf16, fetched once)
            pl.BlockSpec((tm, nh), lambda i: (i, 0)),    # h row tile (f32 residual)
            pl.BlockSpec((tm, nh), lambda i: (i, 0)),    # h0 row tile (bf16)
            pl.BlockSpec(wg_l.shape, lambda i: (0, 0)),  # layer weight
        ],
        out_specs=pl.BlockSpec((tm, nh), lambda i: (i, 0)),
        compiler_params=pltpu.CompilerParams(
            dimension_semantics=("parallel",),           # shards rows across TCs
            vmem_limit_bytes=int(vmem_limit)),
    )(adj_b, h_b, h_f32, h0_b, wg_l)


def _pick_row_tile(N, budget, row_tile=None):
    if row_tile is not None:
        tm = int(row_tile)
        return tm, tm * ((N + tm - 1) // tm)
    cap = max(128, (N // 128) * 128)
    for tm in (1024, 512, 256, 128):
        if tm > cap:
            continue
        Np = tm * ((N + tm - 1) // tm)
        # adj row-tile double buffer (+ headroom) must stay well under budget
        if 6 * tm * Np * 2 + (4 << 20) <= budget:
            return tm, Np
    tm = 128
    return tm, tm * ((N + tm - 1) // tm)


def _tiled_forward(x, adj_b, prep, *, nlayers, lamda, alpha, variant, tm, Np,
                   budget):
    N, nfeat = x.shape
    nhidden = prep["w_fc0"].shape[1]
    in_f = prep["w_gcn"].shape[1]
    if Np != N:
        # Zero row/col padding: padded adj columns are zero, so real rows are
        # unaffected by padded rows; padded output rows are trimmed below.
        x = jnp.pad(x, ((0, Np - N), (0, 0)))
        adj_b = jnp.pad(adj_b, ((0, Np - N), (0, Np - N)))

    vmem_limit = max(16 * 2**20, min(budget, int(
        2 * tm * Np * 2              # adj row tile, double-buffered (bf16)
        + 2 * Np * nhidden * 2       # full h (bf16)
        + 2 * tm * nhidden * 4       # h row tile (f32)
        + 2 * tm * nhidden * 2       # h0 row tile (bf16)
        + 2 * in_f * nhidden * 2     # layer weight (bf16)
        + 2 * tm * nhidden * 4       # output tile (f32)
        + 6 * tm * nhidden * 4       # hi / support / sw / r temporaries
        + (2 << 20))))               # Mosaic internal scratch headroom

    # fcs[0] / fcs[-1] are tiny dense matmuls relative to the spmm; leave to XLA.
    h = jnp.maximum(
        jnp.dot(x.astype(_BF16), prep["w_fc0"],
                preferred_element_type=jnp.float32) + prep["b_fc0"], 0.0)
    h0_b = h.astype(_BF16)
    thetas = _thetas(nlayers, lamda)
    for l in range(nlayers):
        h = _gcn_layer_tiled(adj_b, h, h0_b, prep["w_gcn"][l],
                             theta=thetas[l], alpha=alpha, variant=variant,
                             tm=tm, vmem_limit=vmem_limit)
    out = (jnp.dot(h.astype(_BF16), prep["w_fc1"],
                   preferred_element_type=jnp.float32) + prep["b_fc1"])
    return out[:N]


# ----------------------------------------------------------------------------
# Public wrapper.
# ----------------------------------------------------------------------------
def prepare_params(params):
    """One-time bf16 cast of MXU-facing weights (hoisted out of the per-call path)."""
    return dict(
        w_fc0=params["w_fc0"].astype(_BF16),
        b_fc0=params["b_fc0"].astype(jnp.float32),
        w_gcn=params["w_gcn"].astype(_BF16),
        w_fc1=params["w_fc1"].astype(_BF16),
        b_fc1=params["b_fc1"].astype(jnp.float32),
    )


def graphppis_forward(x, adj, chain_embedding, prep, *, nlayers, lamda, alpha,
                      variant, force_tiled=False, row_tile=None):
    """GraphPPIS.forward: deepGCN(x, adj) concat ProtT5 embedding (dropout = eval)."""
    N, nfeat = x.shape
    nhidden = prep["w_fc0"].shape[1]
    x_b = x if x.dtype == _BF16 else x.astype(_BF16)
    adj_b = adj if adj.dtype == _BF16 else adj.astype(_BF16)

    vmem_cap = _vmem_capacity_bytes()
    budget = int(0.85 * vmem_cap)        # leave compiler headroom (matters on v7x)

    w_bytes = sum(int(a.size) * a.dtype.itemsize for a in prep.values())
    fused_need = (N * N * 2              # adj (bf16)
                  + N * nfeat * 2        # x (bf16)
                  + w_bytes              # weights + biases
                  + N * nhidden * 4      # output (f32)
                  + N * nhidden * 2      # h0 scratch (bf16)
                  + 5 * N * nhidden * 4  # hi / support / sw / r / h temporaries
                  + (2 << 20))           # Mosaic internal scratch headroom

    if force_tiled or fused_need > budget:
        # Large protein: adj no longer fits VMEM; stream adj row tiles, one
        # pallas_call per GCN layer, rows sharded across TensorCores.
        tm, Np = _pick_row_tile(N, budget, row_tile)
        gcn_out = _tiled_forward(x, adj_b, prep, nlayers=nlayers, lamda=lamda,
                                 alpha=alpha, variant=variant, tm=tm, Np=Np,
                                 budget=budget)
    else:
        vmem_limit = max(16 * 2**20, min(budget, int(fused_need)))
        gcn_out = _fused_forward(x_b, adj_b, prep, nlayers=nlayers, lamda=lamda,
                                 alpha=alpha, variant=variant,
                                 vmem_limit=vmem_limit)

    # Concat with the ProtT5 chain embedding left to XLA: the big pass-through
    # tensor never occupies VMEM / vregs inside the kernel.
    return jnp.concatenate([gcn_out, chain_embedding.astype(gcn_out.dtype)], axis=1)


# ----------------------------------------------------------------------------
# Pure-JAX reference and synthetic init.
# ----------------------------------------------------------------------------
def reference_forward(x, adj, chain_embedding, params, *, nlayers, lamda, alpha,
                      variant):
    """Pure-JAX f32 reference mirroring the PyTorch forward (eval mode)."""
    alpha = float(alpha)
    h = jnp.maximum(x @ params["w_fc0"] + params["b_fc0"], 0.0)
    h0 = h
    nhidden = h.shape[1]
    for l in range(nlayers):
        theta = min(1.0, math.log(lamda / (l + 1) + 1.0))
        hi = adj @ h
        w = params["w_gcn"][l]
        if variant:
            sw = hi @ w[:nhidden] + h0 @ w[nhidden:]
            r = (1.0 - alpha) * hi + alpha * h0
        else:
            s = (1.0 - alpha) * hi + alpha * h0
            sw = s @ w
            r = s
        h = jnp.maximum(theta * sw + (1.0 - theta) * r + h, 0.0)
    out = h @ params["w_fc1"] + params["b_fc1"]
    return jnp.concatenate([out, chain_embedding], axis=1)


def init_params(key, nlayers, nfeat, nhidden, variant):
    """Deterministic synthetic init matching the PyTorch __init__ shapes/dists."""
    k0, k1, k2, k3, k4 = jax.random.split(key, 5)
    in_f = 2 * nhidden if variant else nhidden
    s0 = 1.0 / math.sqrt(nfeat)
    w_fc0 = jax.random.uniform(k0, (nfeat, nhidden), jnp.float32, -s0, s0)
    b_fc0 = jax.random.uniform(k1, (1, nhidden), jnp.float32, -s0, s0)
    s1 = 1.0 / math.sqrt(nhidden)
    w_fc1 = jax.random.uniform(k2, (nhidden, nhidden), jnp.float32, -s1, s1)
    b_fc1 = jax.random.uniform(k3, (1, nhidden), jnp.float32, -s1, s1)
    stdv = 1.0 / math.sqrt(nhidden)
    w_gcn = jax.random.uniform(k4, (nlayers, in_f, nhidden), jnp.float32, -stdv, stdv)
    return dict(w_fc0=w_fc0, b_fc0=b_fc0, w_fc1=w_fc1, b_fc1=b_fc1, w_gcn=w_gcn)


if __name__ == "__main__":
    # GraphPPIS hyper-parameters (small synthetic config)
    NLAYERS, NFEAT, NHIDDEN, EMB_DIM = 4, 64, 128, 64
    LAMDA, ALPHA, VARIANT = 1.5, 0.7, True
    N = 128  # number of residues / graph nodes

    key = jax.random.PRNGKey(0)
    kx, kadj, kemb, kparam = jax.random.split(key, 4)

    x = jax.random.uniform(kx, (N, NFEAT), jnp.float32)
    # dense row-normalized adjacency standing in for the sparse adj of the model
    adj_raw = jax.random.uniform(kadj, (N, N), jnp.float32)
    adj = adj_raw / jnp.sum(adj_raw, axis=1, keepdims=True)
    # TODO(synk): original code loads ProtT5 embeddings from ./Embeddings/<seq>.npy;
    # synthesized deterministically here instead of reading files.
    chain_embedding = jax.random.normal(kemb, (N, EMB_DIM), jnp.float32)

    params = init_params(kparam, NLAYERS, NFEAT, NHIDDEN, VARIANT)

    # one-time (cached) bf16 casts, hoisted out of the per-call wrapper
    prep = prepare_params(params)
    adj_bf16 = adj.astype(jnp.bfloat16)

    fwd = jax.jit(functools.partial(
        graphppis_forward, nlayers=NLAYERS, lamda=LAMDA, alpha=ALPHA,
        variant=VARIANT))
    out = jax.block_until_ready(fwd(x, adj_bf16, chain_embedding, prep))

    ref = reference_forward(x, adj, chain_embedding, params, nlayers=NLAYERS,
                            lamda=LAMDA, alpha=ALPHA, variant=VARIANT)
    assert out.shape == (N, NHIDDEN + EMB_DIM)
    # bf16 MXU inputs with f32 accumulation; observed error ~1e-3, inside tolerance.
    np.testing.assert_allclose(np.asarray(out), np.asarray(ref), rtol=2e-2, atol=2e-2)

    # Also exercise the row-tiled per-layer path (auto-selected for large proteins
    # where adj would not fit VMEM) at a small forced size / tile.
    N2 = 256
    k2x, k2adj, k2emb = jax.random.split(jax.random.PRNGKey(1), 3)
    x2 = jax.random.uniform(k2x, (N2, NFEAT), jnp.float32)
    adj2_raw = jax.random.uniform(k2adj, (N2, N2), jnp.float32)
    adj2 = adj2_raw / jnp.sum(adj2_raw, axis=1, keepdims=True)
    emb2 = jax.random.normal(k2emb, (N2, EMB_DIM), jnp.float32)

    fwd_tiled = jax.jit(functools.partial(
        graphppis_forward, nlayers=NLAYERS, lamda=LAMDA, alpha=ALPHA,
        variant=VARIANT, force_tiled=True, row_tile=128))
    out2 = jax.block_until_ready(
        fwd_tiled(x2, adj2.astype(jnp.bfloat16), emb2, prep))
    ref2 = reference_forward(x2, adj2, emb2, params, nlayers=NLAYERS, lamda=LAMDA,
                             alpha=ALPHA, variant=VARIANT)
    assert out2.shape == (N2, NHIDDEN + EMB_DIM)
    np.testing.assert_allclose(np.asarray(out2), np.asarray(ref2), rtol=2e-2,
                               atol=2e-2)

    print("KERNEL_OK")
</pallas_src>

<mosaic_0001>
module attributes {stable_mosaic.version = 11 : i64} {
  func.func @kernel(%arg0: memref<128x64xbf16, #tpu.memory_space<vmem>>, %arg1: memref<128x128xbf16, #tpu.memory_space<vmem>>, %arg2: memref<64x128xbf16, #tpu.memory_space<vmem>>, %arg3: memref<1x128xf32, #tpu.memory_space<vmem>>, %arg4: memref<4x256x128xbf16, #tpu.memory_space<vmem>>, %arg5: memref<128x128xbf16, #tpu.memory_space<vmem>>, %arg6: memref<1x128xf32, #tpu.memory_space<vmem>>, %arg7: memref<128x128xf32, #tpu.memory_space<vmem>>, %arg8: memref<128x128xbf16, #tpu.memory_space<vmem>>) attributes {dimension_semantics = [], scalar_prefetch = 0 : i64, scratch_operands = 1 : i64, tpu.core_type = #tpu.core_type<tc>} {
    %c0 = arith.constant 0 : index
    %c0_0 = arith.constant 0 : index
    %0 = vector.load %arg0[%c0, %c0_0] : memref<128x64xbf16, #tpu.memory_space<vmem>>, vector<128x64xbf16>
    %c0_1 = arith.constant 0 : index
    %c0_2 = arith.constant 0 : index
    %1 = vector.load %arg2[%c0_1, %c0_2] : memref<64x128xbf16, #tpu.memory_space<vmem>>, vector<64x128xbf16>
    %cst = arith.constant dense<0.000000e+00> : vector<128x128xf32>
    %2 = tpu.matmul %0, %1, %cst {dimension_numbers = #tpu.dot_dimension_numbers<[1], [0], [0], [1], [0, 0, 1, 1], [], []>} : vector<128x64xbf16>, vector<64x128xbf16>, vector<128x128xf32> -> vector<128x128xf32>
    %c0_3 = arith.constant 0 : index
    %c0_4 = arith.constant 0 : index
    %3 = vector.load %arg3[%c0_3, %c0_4] : memref<1x128xf32, #tpu.memory_space<vmem>>, vector<1x128xf32>
    %4 = vector.broadcast %3 : vector<1x128xf32> to vector<128x128xf32>
    %5 = arith.addf %2, %4 : vector<128x128xf32>
    %cst_5 = arith.constant 0.000000e+00 : f32
    %6 = vector.broadcast %cst_5 : f32 to vector<128x128xf32>
    %7 = arith.maximumf %5, %6 : vector<128x128xf32>
    %8 = arith.truncf %7 : vector<128x128xf32> to vector<128x128xbf16>
    %c0_6 = arith.constant 0 : index
    %c0_7 = arith.constant 0 : index
    %9 = vector.load %arg8[%c0_6, %c0_7] : memref<128x128xbf16, #tpu.memory_space<vmem>>, vector<128x128xbf16>
    tpu.vector_store %arg8[%c0_6, %c0_7], %8 {strides = array<i32>} : memref<128x128xbf16, #tpu.memory_space<vmem>>, vector<128x128xbf16>,
    %c0_8 = arith.constant 0 : index
    %c0_9 = arith.constant 0 : index
    %10 = vector.load %arg1[%c0_8, %c0_9] : memref<128x128xbf16, #tpu.memory_space<vmem>>, vector<128x128xbf16>
    %11 = arith.truncf %7 : vector<128x128xf32> to vector<128x128xbf16>
    %cst_10 = arith.constant dense<0.000000e+00> : vector<128x128xf32>
    %12 = tpu.matmul %10, %11, %cst_10 {dimension_numbers = #tpu.dot_dimension_numbers<[1], [0], [0], [1], [0, 0, 1, 1], [], []>} : vector<128x128xbf16>, vector<128x128xbf16>, vector<128x128xf32> -> vector<128x128xf32>
    %c0_11 = arith.constant 0 : index
    %c0_12 = arith.constant 0 : index
    %13 = vector.load %arg8[%c0_11, %c0_12] : memref<128x128xbf16, #tpu.memory_space<vmem>>, vector<128x128xbf16>
    %14 = arith.truncf %12 : vector<128x128xf32> to vector<128x128xbf16>
    %15 = tpu.concatenate %14, %13 in 1 : vector<128x128xbf16>, vector<128x128xbf16> -> vector<128x256xbf16>
    %c0_13 = arith.constant 0 : index
    %c0_14 = arith.constant 0 : index
    %c0_15 = arith.constant 0 : index
    %16 = vector.load %arg4[%c0_13, %c0_14, %c0_15] : memref<4x256x128xbf16, #tpu.memory_space<vmem>>, vector<1x256x128xbf16>
    %17 = vector.shape_cast %16 : vector<1x256x128xbf16> to vector<256x128xbf16>
    %cst_16 = arith.constant dense<0.000000e+00> : vector<128x128xf32>
    %18 = tpu.matmul %15, %17, %cst_16 {dimension_numbers = #tpu.dot_dimension_numbers<[1], [0], [0], [1], [0, 0, 1, 1], [], []>} : vector<128x256xbf16>, vector<256x128xbf16>, vector<128x128xf32> -> vector<128x128xf32>
    %cst_17 = arith.constant 3.000000e-01 : f32
    %19 = vector.broadcast %cst_17 : f32 to vector<128x128xf32>
    %20 = arith.mulf %19, %12 : vector<128x128xf32>
    %21 = arith.extf %13 : vector<128x128xbf16> to vector<128x128xf32>
    %cst_18 = arith.constant 0.699999988 : f32
    %22 = vector.broadcast %cst_18 : f32 to vector<128x128xf32>
    %23 = arith.mulf %22, %21 : vector<128x128xf32>
    %24 = arith.addf %20, %23 : vector<128x128xf32>
    %cst_19 = arith.constant 0.91629076 : f32
    %25 = vector.broadcast %cst_19 : f32 to vector<128x128xf32>
    %26 = arith.mulf %25, %18 : vector<128x128xf32>
    %cst_20 = arith.constant 0.0837092697 : f32
    %27 = vector.broadcast %cst_20 : f32 to vector<128x128xf32>
    %28 = arith.mulf %27, %24 : vector<128x128xf32>
    %29 = arith.addf %26, %28 : vector<128x128xf32>
    %30 = arith.addf %29, %7 : vector<128x128xf32>
    %cst_21 = arith.constant 0.000000e+00 : f32
    %31 = vector.broadcast %cst_21 : f32 to vector<128x128xf32>
    %32 = arith.maximumf %30, %31 : vector<128x128xf32>
    %c0_22 = arith.constant 0 : index
    %c0_23 = arith.constant 0 : index
    %33 = vector.load %arg1[%c0_22, %c0_23] : memref<128x128xbf16, #tpu.memory_space<vmem>>, vector<128x128xbf16>
    %34 = arith.truncf %32 : vector<128x128xf32> to vector<128x128xbf16>
    %cst_24 = arith.constant dense<0.000000e+00> : vector<128x128xf32>
    %35 = tpu.matmul %33, %34, %cst_24 {dimension_numbers = #tpu.dot_dimension_numbers<[1], [0], [0], [1], [0, 0, 1, 1], [], []>} : vector<128x128xbf16>, vector<128x128xbf16>, vector<128x128xf32> -> vector<128x128xf32>
    %c0_25 = arith.constant 0 : index
    %c0_26 = arith.constant 0 : index
    %36 = vector.load %arg8[%c0_25, %c0_26] : memref<128x128xbf16, #tpu.memory_space<vmem>>, vector<128x128xbf16>
    %37 = arith.truncf %35 : vector<128x128xf32> to vector<128x128xbf16>
    %38 = tpu.concatenate %37, %36 in 1 : vector<128x128xbf16>, vector<128x128xbf16> -> vector<128x256xbf16>
    %c1 = arith.constant 1 : index
    %c0_27 = arith.constant 0 : index
    %c0_28 = arith.constant 0 : index
    %39 = vector.load %arg4[%c1, %c0_27, %c0_28] : memref<4x256x128xbf16, #tpu.memory_space<vmem>>, vector<1x256x128xbf16>
    %40 = vector.shape_cast %39 : vector<1x256x128xbf16> to vector<256x128xbf16>
    %cst_29 = arith.constant dense<0.000000e+00> : vector<128x128xf32>
    %41 = tpu.matmul %38, %40, %cst_29 {dimension_numbers = #tpu.dot_dimension_numbers<[1], [0], [0], [1], [0, 0, 1, 1], [], []>} : vector<128x256xbf16>, vector<256x128xbf16>, vector<128x128xf32> -> vector<128x128xf32>
    %cst_30 = arith.constant 3.000000e-01 : f32
    %42 = vector.broadcast %cst_30 : f32 to vector<128x128xf32>
    %43 = arith.mulf %42, %35 : vector<128x128xf32>
    %44 = arith.extf %36 : vector<128x128xbf16> to vector<128x128xf32>
    %cst_31 = arith.constant 0.699999988 : f32
    %45 = vector.broadcast %cst_31 : f32 to vector<128x128xf32>
    %46 = arith.mulf %45, %44 : vector<128x128xf32>
    %47 = arith.addf %43, %46 : vector<128x128xf32>
    %cst_32 = arith.constant 0.559615791 : f32
    %48 = vector.broadcast %cst_32 : f32 to vector<128x128xf32>
    %49 = arith.mulf %48, %41 : vector<128x128xf32>
    %cst_33 = arith.constant 0.440384209 : f32
    %50 = vector.broadcast %cst_33 : f32 to vector<128x128xf32>
    %51 = arith.mulf %50, %47 : vector<128x128xf32>
    %52 = arith.addf %49, %51 : vector<128x128xf32>
    %53 = arith.addf %52, %32 : vector<128x128xf32>
    %cst_34 = arith.constant 0.000000e+00 : f32
    %54 = vector.broadcast %cst_34 : f32 to vector<128x128xf32>
    %55 = arith.maximumf %53, %54 : vector<128x128xf32>
    %c0_35 = arith.constant 0 : index
    %c0_36 = arith.constant 0 : index
    %56 = vector.load %arg1[%c0_35, %c0_36] : memref<128x128xbf16, #tpu.memory_space<vmem>>, vector<128x128xbf16>
    %57 = arith.truncf %55 : vector<128x128xf32> to vector<128x128xbf16>
    %cst_37 = arith.constant dense<0.000000e+00> : vector<128x128xf32>
    %58 = tpu.matmul %56, %57, %cst_37 {dimension_numbers = #tpu.dot_dimension_numbers<[1], [0], [0], [1], [0, 0, 1, 1], [], []>} : vector<128x128xbf16>, vector<128x128xbf16>, vector<128x128xf32> -> vector<128x128xf32>
    %c0_38 = arith.constant 0 : index
    %c0_39 = arith.constant 0 : index
    %59 = vector.load %arg8[%c0_38, %c0_39] : memref<128x128xbf16, #tpu.memory_space<vmem>>, vector<128x128xbf16>
    %60 = arith.truncf %58 : vector<128x128xf32> to vector<128x128xbf16>
    %61 = tpu.concatenate %60, %59 in 1 : vector<128x128xbf16>, vector<128x128xbf16> -> vector<128x256xbf16>
    %c2 = arith.constant 2 : index
    %c0_40 = arith.constant 0 : index
    %c0_41 = arith.constant 0 : index
    %62 = vector.load %arg4[%c2, %c0_40, %c0_41] : memref<4x256x128xbf16, #tpu.memory_space<vmem>>, vector<1x256x128xbf16>
    %63 = vector.shape_cast %62 : vector<1x256x128xbf16> to vector<256x128xbf16>
    %cst_42 = arith.constant dense<0.000000e+00> : vector<128x128xf32>
    %64 = tpu.matmul %61, %63, %cst_42 {dimension_numbers = #tpu.dot_dimension_numbers<[1], [0], [0], [1], [0, 0, 1, 1], [], []>} : vector<128x256xbf16>, vector<256x128xbf16>, vector<128x128xf32> -> vector<128x128xf32>
    %cst_43 = arith.constant 3.000000e-01 : f32
    %65 = vector.broadcast %cst_43 : f32 to vector<128x128xf32>
    %66 = arith.mulf %65, %58 : vector<128x128xf32>
    %67 = arith.extf %59 : vector<128x128xbf16> to vector<128x128xf32>
    %cst_44 = arith.constant 0.699999988 : f32
    %68 = vector.broadcast %cst_44 : f32 to vector<128x128xf32>
    %69 = arith.mulf %68, %67 : vector<128x128xf32>
    %70 = arith.addf %66, %69 : vector<128x128xf32>
    %cst_45 = arith.constant 0.405465096 : f32
    %71 = vector.broadcast %cst_45 : f32 to vector<128x128xf32>
    %72 = arith.mulf %71, %64 : vector<128x128xf32>
    %cst_46 = arith.constant 0.594534874 : f32
    %73 = vector.broadcast %cst_46 : f32 to vector<128x128xf32>
    %74 = arith.mulf %73, %70 : vector<128x128xf32>
    %75 = arith.addf %72, %74 : vector<128x128xf32>
    %76 = arith.addf %75, %55 : vector<128x128xf32>
    %cst_47 = arith.constant 0.000000e+00 : f32
    %77 = vector.broadcast %cst_47 : f32 to vector<128x128xf32>
    %78 = arith.maximumf %76, %77 : vector<128x128xf32>
    %c0_48 = arith.constant 0 : index
    %c0_49 = arith.constant 0 : index
    %79 = vector.load %arg1[%c0_48, %c0_49] : memref<128x128xbf16, #tpu.memory_space<vmem>>, vector<128x128xbf16>
    %80 = arith.truncf %78 : vector<128x128xf32> to vector<128x128xbf16>
    %cst_50 = arith.constant dense<0.000000e+00> : vector<128x128xf32>
    %81 = tpu.matmul %79, %80, %cst_50 {dimension_numbers = #tpu.dot_dimension_numbers<[1], [0], [0], [1], [0, 0, 1, 1], [], []>} : vector<128x128xbf16>, vector<128x128xbf16>, vector<128x128xf32> -> vector<128x128xf32>
    %c0_51 = arith.constant 0 : index
    %c0_52 = arith.constant 0 : index
    %82 = vector.load %arg8[%c0_51, %c0_52] : memref<128x128xbf16, #tpu.memory_space<vmem>>, vector<128x128xbf16>
    %83 = arith.truncf %81 : vector<128x128xf32> to vector<128x128xbf16>
    %84 = tpu.concatenate %83, %82 in 1 : vector<128x128xbf16>, vector<128x128xbf16> -> vector<128x256xbf16>
    %c3 = arith.constant 3 : index
    %c0_53 = arith.constant 0 : index
    %c0_54 = arith.constant 0 : index
    %85 = vector.load %arg4[%c3, %c0_53, %c0_54] : memref<4x256x128xbf16, #tpu.memory_space<vmem>>, vector<1x256x128xbf16>
    %86 = vector.shape_cast %85 : vector<1x256x128xbf16> to vector<256x128xbf16>
    %cst_55 = arith.constant dense<0.000000e+00> : vector<128x128xf32>
    %87 = tpu.matmul %84, %86, %cst_55 {dimension_numbers = #tpu.dot_dimension_numbers<[1], [0], [0], [1], [0, 0, 1, 1], [], []>} : vector<128x256xbf16>, vector<256x128xbf16>, vector<128x128xf32> -> vector<128x128xf32>
    %cst_56 = arith.constant 3.000000e-01 : f32
    %88 = vector.broadcast %cst_56 : f32 to vector<128x128xf32>
    %89 = arith.mulf %88, %81 : vector<128x128xf32>
    %90 = arith.extf %82 : vector<128x128xbf16> to vector<128x128xf32>
    %cst_57 = arith.constant 0.699999988 : f32
    %91 = vector.broadcast %cst_57 : f32 to vector<128x128xf32>
    %92 = arith.mulf %91, %90 : vector<128x128xf32>
    %93 = arith.addf %89, %92 : vector<128x128xf32>
    %cst_58 = arith.constant 0.318453729 : f32
    %94 = vector.broadcast %cst_58 : f32 to vector<128x128xf32>
    %95 = arith.mulf %94, %87 : vector<128x128xf32>
    %cst_59 = arith.constant 0.68154627 : f32
    %96 = vector.broadcast %cst_59 : f32 to vector<128x128xf32>
    %97 = arith.mulf %96, %93 : vector<128x128xf32>
    %98 = arith.addf %95, %97 : vector<128x128xf32>
    %99 = arith.addf %98, %78 : vector<128x128xf32>
    %cst_60 = arith.constant 0.000000e+00 : f32
    %100 = vector.broadcast %cst_60 : f32 to vector<128x128xf32>
    %101 = arith.maximumf %99, %100 : vector<128x128xf32>
    %102 = arith.truncf %101 : vector<128x128xf32> to vector<128x128xbf16>
    %c0_61 = arith.constant 0 : index
    %c0_62 = arith.constant 0 : index
    %103 = vector.load %arg5[%c0_61, %c0_62] : memref<128x128xbf16, #tpu.memory_space<vmem>>, vector<128x128xbf16>
    %cst_63 = arith.constant dense<0.000000e+00> : vector<128x128xf32>
    %104 = tpu.matmul %102, %103, %cst_63 {dimension_numbers = #tpu.dot_dimension_numbers<[1], [0], [0], [1], [0, 0, 1, 1], [], []>} : vector<128x128xbf16>, vector<128x128xbf16>, vector<128x128xf32> -> vector<128x128xf32>
    %c0_64 = arith.constant 0 : index
    %c0_65 = arith.constant 0 : index
    %105 = vector.load %arg6[%c0_64, %c0_65] : memref<1x128xf32, #tpu.memory_space<vmem>>, vector<1x128xf32>
    %106 = vector.broadcast %105 : vector<1x128xf32> to vector<128x128xf32>
    %107 = arith.addf %104, %106 : vector<128x128xf32>
    %c0_66 = arith.constant 0 : index
    %c0_67 = arith.constant 0 : index
    %108 = vector.load %arg7[%c0_66, %c0_67] : memref<128x128xf32, #tpu.memory_space<vmem>>, vector<128x128xf32>
    tpu.vector_store %arg7[%c0_66, %c0_67], %107 {strides = array<i32>} : memref<128x128xf32, #tpu.memory_space<vmem>>, vector<128x128xf32>,
    return
  }
}

</mosaic_0001>

<bundles_post_ra>
// kernel: graphppis_forward.1
= control target key start
LH: loop header
LB: loop body
LE: loop exit
PB: predicated region body
PF: predicated region fallthrough
CT: control target
= control target key end

     0   :  { %12 = vsyncpa [#allocation4], 0  ;;  %s3056_s27 = smov [#allocation3]   ;;  %s3057_s29 = smov 64   ;;  %s4397_s0 = inlined_call_operand.vmem [shape: bf16[128,64], index: 0, kind: input, shape index: {}]   ;;  %s4398_s1 = inlined_call_operand.vmem [shape: bf16[128,128], index: 1, kind: input, shape index: {}]   ;;  %s4399_s2 = inlined_call_operand.vmem [shape: bf16[64,128], index: 2, kind: input, shape index: {}]   ;;  %s4400_s3 = inlined_call_operand.vmem [shape: f32[1,128], index: 3, kind: input, shape index: {}]   ;;  %s4401_s4 = inlined_call_operand.hbm [shape: bf16[4,256,128], index: 4, kind: input, shape index: {}]   ;;  %s4402_s5 = inlined_call_operand.vmem [shape: bf16[128,128], index: 5, kind: input, shape index: {}]   ;;  %s4403_s6 = inlined_call_operand.vmem [shape: f32[1,128], index: 6, kind: input, shape index: {}]   ;;  %s4404_s7 = inlined_call_operand.vmem [shape: f32[128,128], index: 7, kind: output, shape index: {}]  }
   0x1   :  { %s25_s26 = sshll.u32 %s4401_s4, 4  ;;  %s27_s28 = sshll.u32 %s3056_s27, 4  ;;  %s26_s26 = int_to_ptr.hbm [resolvable:$true] %s25_s26  ;;  %s28_s28 = int_to_ptr.vmem [resolvable:$true] %s27_s28 }
   0x2   :  { %s3058_s30 = smov 4  }
   0x3   :  { %33 = dma.hbm_to_vmem [thread:$0]  %s26_s26, 8192, %s28_s28, [#allocation4], %s3057_s29, %s3057_s29, %s3058_s30  }
   0x4   :  { %3054 = dma.done.wait [#allocation4], 8192  }
   0x5   :  { %3055 = vsyncadd [#allocation4], 4294959104  ;;  %v2861_v0 = vld [vmem:[%s4399_s2 + $0x18] sm:$0xff]  ;;  %v2860_v1 = vld [vmem:[%s4399_s2 + $0x10] sm:$0xff]  ;;  %vm135_vm0 = vcmask 523264  }
   0x6   :  { %164 = vmatpush.bf16.msra.mxu0 %v2861_v0  ;;  %2997 = vmatpush.bf16.msra.mxu3 %v2861_v0  ;;  %v2859_v2 = vld [vmem:[%s4399_s2 + $0x8] sm:$0xff]  ;;  %v2858_v3 = vld [vmem:[%s4399_s2] sm:$0xff]  ;;  %v2856_v7 = vld [vmem:[%s4397_s0 + $0x30] sm:$0xff] }
   0x7   :  { %v2850_v4 = vld [vmem:[%s4397_s0] sm:$0xff]  ;;  %v2855_v5 = vld [vmem:[%s4397_s0 + $0x28] sm:$0xff]  ;;  %v2852_v8 = vld [vmem:[%s4397_s0 + $0x10] sm:$0xff] }
   0x8   :  { %v2851_v6 = vld [vmem:[%s4397_s0 + $0x8] sm:$0xff]  ;;  %v2857_v9 = vld [vmem:[%s4397_s0 + $0x38] sm:$0xff]  ;;  %v2892_v11 = vld [vmem:[#allocation3 + $0x70] sm:$0xff] }
   0x9   :  { %v2893_v10 = vld [vmem:[#allocation3 + $0x78] sm:$0xff]  ;;  %v2854_v13 = vld [vmem:[%s4397_s0 + $0x20] sm:$0xff]  ;;  %v2891_v14 = vld [vmem:[#allocation3 + $0x68] sm:$0xff] }
   0xa   :  { %165 = vmatpush.bf16.msra.mxu0 %v2860_v1  ;;  %2998 = vmatpush.bf16.msra.mxu3 %v2860_v1  ;;  %v2853_v12 = vld [vmem:[%s4397_s0 + $0x18] sm:$0xff]  ;;  %v2890_v15 = vld [vmem:[#allocation3 + $0x60] sm:$0xff]  ;;  %v2888_v17 = vld [vmem:[#allocation3 + $0x50] sm:$0xff] }
   0xb   :  { %v2889_v16 = vld [vmem:[#allocation3 + $0x58] sm:$0xff]  ;;  %v2887_v18 = vld [vmem:[#allocation3 + $0x48] sm:$0xff]  ;;  %v2886_v19 = vld [vmem:[#allocation3 + $0x40] sm:$0xff] }
   0xc   :  { %v3149_v21 = vld [vmem:[%s4400_s3] ss:$0 sm:$0xff] }
   0xe   :  { %166 = vmatpush.bf16.msra.mxu0 %v2859_v2  ;;  %2999 = vmatpush.bf16.msra.mxu3 %v2859_v2 }
  0x12   :  { %167 = vmatpush.bf16.msra.mxu0 %v2858_v3  ;;  %3000 = vmatpush.bf16.msra.mxu3 %v2858_v3 }
  0x15   :  { %2490 = vmatmul.msk.bf16.vlgmr.msra.gmra.mxu0 %vm135_vm0, %v2850_v4  ;;  %2495 = vmatmul.msk.bf16.vlgmr.msra.gmra.mxu3 %vm135_vm0, %v2855_v5 }
  0x16   :  { %723 = vmatpush.bf16.msrb.mxu3 %v2893_v10 }
  0x1a   :  { %724 = vmatpush.bf16.msrb.mxu3 %v2892_v11 }
  0x1e   :  { %725 = vmatpush.bf16.msrb.mxu3 %v2891_v14 }
  0x22   :  { %726 = vmatpush.bf16.msrb.mxu3 %v2890_v15 }
  0x25   :  { %2491 = vmatmul.msk.bf16.gmra.mxu0 %vm135_vm0, %v2851_v6  ;;  %2496 = vmatmul.msk.bf16.gmra.mxu3 %vm135_vm0, %v2856_v7 }
  0x26   :  { %727 = vmatpush.bf16.msrb.mxu3 %v2889_v16 }
  0x2a   :  { %728 = vmatpush.bf16.msrb.mxu3 %v2888_v17 }
  0x2e   :  { %729 = vmatpush.bf16.msrb.mxu3 %v2887_v18 }
  0x32   :  { %730 = vmatpush.bf16.msrb.mxu3 %v2886_v19 }
  0x35   :  { %2492 = vmatmul.msk.bf16.gmra.mxu0 %vm135_vm0, %v2852_v8  ;;  %2497 = vmatmul.msk.bf16.gmra.mxu3 %vm135_vm0, %v2857_v9 }
  0x45   :  { %2493 = vmatmul.msk.bf16.gmra.mxu0 %vm135_vm0, %v2853_v12 }
  0x55   :  { %2494 = vmatmul.msk.bf16.gmra.mxu0 %vm135_vm0, %v2854_v13 }
  0x92   :  { %v169_v20 = vpop.f32.mrf.mxu0 }
  0x93   :  { %v170_v23 = vadd.f32 %v3149_v21, %v169_v20 }
  0x95   :  { %v3153_v26 = vmax.f32 %v170_v23, 0.0 }
  0x97   :  { %4511 = vst [vmem:[#allocation6_spill] sm:$0xff] %v3153_v26 }
  0x98   :  { %v194_v22 = vpop.f32.mrf.mxu3 }
  0x99   :  { %v195_v27 = vadd.f32 %v3149_v21, %v194_v22 }
  0x9a   :  { %v171_v24 = vpop.f32.mrf.mxu0 }
  0x9b   :  { %v172_v25 = vadd.f32 %v3149_v21, %v171_v24  ;;  %v3160_v31 = vmax.f32 %v195_v27, 0.0 }
  0x9d   :  { %v3156_v28 = vmax.f32 %v172_v25, 0.0  ;;  %v235_v9 = vpack.c.bf16 %v3160_v31, %v3160_v31 }
  0x9f   :  { %4512 = vst [vmem:[#allocation7_spill] sm:$0xff] %v3156_v28  ;;  %v2953_v29 = vpack.c.bf16 %v3156_v28, %v3153_v26  ;;  %v347_v17 = vunpack.c.l.b16 %v235_v9  ;;  %v3265_v9 = vld [vmem:[%s4398_s1] sm:$0xff] }
  0xa0   :  { %v196_v30 = vpop.f32.mrf.mxu3  ;;  %4518 = vst [vmem:[#allocation13_spill] sm:$0xff] %v3265_v9 }
  0xa1   :  { %2954 = vst [vmem:[#allocation2] sm:$0xff] %v2953_v29   ;;  %v197_v32 = vadd.f32 %v3149_v21, %v196_v30 }
  0xa2   :  { %v174_v33 = vpop.f32.mrf.mxu0 }
  0xa3   :  { %v3163_v34 = vmax.f32 %v197_v32, 0.0  ;;  %v175_v38 = vadd.f32 %v3149_v21, %v174_v33 }
  0xa5   :  { %v2978_v35 = vpack.c.bf16 %v3163_v34, %v3160_v31  ;;  %v3172_v41 = vmax.f32 %v175_v38, 0.0  ;;  %v236_v10 = vpack.c.bf16 %v3163_v34, %v3163_v34 }
  0xa7   :  { %2994 = vst [vmem:[#allocation2 + $0x28] sm:$0xff] %v2978_v35   ;;  %v348_v22 = vunpack.c.l.b16 %v236_v10  ;;  %v3270_v10 = vld [vmem:[%s4398_s1 + $0x20] sm:$0xff] }
  0xa8   :  { %v199_v36 = vpop.f32.mrf.mxu3  ;;  %v3167_v37 = vld [vmem:[#allocation2] sm:$0xff]  ;;  %4513 = vst [vmem:[#allocation8_spill] sm:$0xff] %v3172_v41 }
  0xa9   :  { %731 = vmatmul.bf16.vlgmr.msrb.gmra.mxu3 %v3167_v37  ;;  %v200_v42 = vadd.f32 %v3149_v21, %v199_v36  ;;  %v358_v24 = vpack.c.b16 %v348_v22, %v347_v17  ;;  %4519 = vst [vmem:[#allocation14_spill] sm:$0xff] %v3270_v10  ;;  %v3315_v22 = vld [vmem:[%s4398_s1 + $0x38] sm:$0xff] }
  0xaa   :  { %v176_v39 = vpop.f32.mrf.mxu0  ;;  %4528 = vst [vmem:[#allocation23_spill] sm:$0xff] %v3315_v22 }
  0xab   :  { %v177_v40 = vadd.f32 %v3149_v21, %v176_v39  ;;  %v3179_v46 = vmax.f32 %v200_v42, 0.0 }
  0xad   :  { %v3175_v43 = vmax.f32 %v177_v40, 0.0  ;;  %v237_v2 = vpack.c.bf16 %v3179_v46, %v3179_v46 }
  0xaf   :  { %4514 = vst [vmem:[#allocation9_spill] sm:$0xff] %v3175_v43  ;;  %v2958_v44 = vpack.c.bf16 %v3175_v43, %v3172_v41  ;;  %v349_v13 = vunpack.c.l.b16 %v237_v2 }
  0xb0   :  { %v201_v45 = vpop.f32.mrf.mxu3 }
  0xb1   :  { %2990 = vst [vmem:[#allocation2 + $0x8] sm:$0xff] %v2958_v44   ;;  %v202_v47 = vadd.f32 %v3149_v21, %v201_v45 }
  0xb2   :  { %v179_v48 = vpop.f32.mrf.mxu0 }
  0xb3   :  { %v3182_v49 = vmax.f32 %v202_v47, 0.0  ;;  %v180_v53 = vadd.f32 %v3149_v21, %v179_v48 }
  0xb5   :  { %v2983_v50 = vpack.c.bf16 %v3182_v49, %v3179_v46  ;;  %v3192_v57 = vmax.f32 %v180_v53, 0.0  ;;  %v238_v6 = vpack.c.bf16 %v3182_v49, %v3182_v49 }
  0xb7   :  { %2995 = vst [vmem:[#allocation2 + $0x30] sm:$0xff] %v2983_v50   ;;  %v350_v14 = vunpack.c.l.b16 %v238_v6 }
  0xb8   :  { %v204_v51 = vpop.f32.mrf.mxu3  ;;  %v3186_v52 = vld [vmem:[#allocation2 + $0x8] sm:$0xff]  ;;  %4515 = vst [vmem:[#allocation10_spill] sm:$0xff] %v3192_v57 }
  0xb9   :  { %v205_v54 = vadd.f32 %v3149_v21, %v204_v51  ;;  %736 = vmatmul.bf16.gmra.mxu3 %v3186_v52  ;;  %v359_v20 = vpack.c.b16 %v350_v14, %v349_v13  ;;  %v229_v51 = vpack.c.bf16 %v3192_v57, %v3192_v57  ;;  %v3285_v13 = vld [vmem:[%s4398_s1 + $0x28] sm:$0xff] }
  0xba   :  { %v181_v55 = vpop.f32.mrf.mxu0  ;;  %4522 = vst [vmem:[#allocation17_spill] sm:$0xff] %v3285_v13 }
  0xbb   :  { %v182_v56 = vadd.f32 %v3149_v21, %v181_v55  ;;  %v3194_v58 = vmax.f32 %v205_v54, 0.0  ;;  %v228_v55 = vpack.c.bf16 %v3175_v43, %v3175_v43 }
  0xbd   :  { %v3196_v59 = vmax.f32 %v182_v56, 0.0  ;;  %v239_v63 = vpack.c.bf16 %v3194_v58, %v3194_v58 }
  0xbe   :  { %v3289_v14 = vld [vmem:[#allocation2 + $0x30] sm:$0xff] }
  0xbf   :  { %4516 = vst [vmem:[#allocation11_spill] sm:$0xff] %v3196_v59  ;;  %v2963_v60 = vpack.c.bf16 %v3196_v59, %v3192_v57  ;;  %v351_v5 = vunpack.c.l.b16 %v239_v63  ;;  %v230_v48 = vpack.c.bf16 %v3196_v59, %v3196_v59  ;;  %v340_v63 = vunpack.c.l.b16 %v228_v55 }
  0xc0   :  { %v206_v61 = vpop.f32.mrf.mxu3  ;;  %4523 = vst [vmem:[#allocation18_spill] sm:$0xff] %v3289_v14 }
  0xc1   :  { %2991 = vst [vmem:[#allocation2 + $0x10] sm:$0xff] %v2963_v60   ;;  %v207_v62 = vadd.f32 %v3149_v21, %v206_v61  ;;  %v342_v54 = vunpack.c.l.b16 %v230_v48  ;;  %v341_v60 = vunpack.c.l.b16 %v229_v51  ;;  %v227_v61 = vpack.c.bf16 %v3172_v41, %v3172_v41 }
  0xc2   :  { %v184_v0 = vpop.f32.mrf.mxu0 }
  0xc3   :  { %v3203_v1 = vmax.f32 %v207_v62, 0.0  ;;  %v185_v11 = vadd.f32 %v3149_v21, %v184_v0  ;;  %v355_v62 = vpack.c.b16 %v342_v54, %v341_v60  ;;  %v226_v0 = vpack.c.bf16 %v3156_v28, %v3156_v28 }
  0xc4   :  { %v339_v2 = vunpack.c.l.b16 %v227_v61 }
  0xc5   :  { %v2988_v3 = vpack.c.bf16 %v3203_v1, %v3194_v58  ;;  %v240_v4 = vpack.c.bf16 %v3203_v1, %v3203_v1  ;;  %v3222_v18 = vmax.f32 %v185_v11, 0.0  ;;  %v3274_v11 = vld [vmem:[#allocation2 + $0x28] sm:$0xff] }
  0xc6   :  { %4520 = vst [vmem:[#allocation15_spill] sm:$0xff] %v3274_v11 }
  0xc7   :  { %2996 = vst [vmem:[#allocation2 + $0x38] sm:$0xff] %v2988_v3   ;;  %v352_v7 = vunpack.c.l.b16 %v240_v4  ;;  %v225_v3 = vpack.c.bf16 %v3153_v26, %v3153_v26  ;;  %v354_v4 = vpack.c.b16 %v340_v63, %v339_v2 }
  0xc8   :  { %v3213_v8 = vld [vmem:[#allocation2 + $0x10] sm:$0xff]  ;;  %4517 = vst [vmem:[#allocation12_spill] sm:$0xff] %v3222_v18 }
  0xc9   :  { %v360_v12 = vpack.c.b16 %v352_v7, %v351_v5  ;;  %741 = vmatmul.bf16.gmra.mxu3 %v3213_v8  ;;  %v338_v5 = vunpack.c.l.b16 %v226_v0  ;;  %v337_v6 = vunpack.c.l.b16 %v225_v3 }
  0xca   :  { %v186_v15 = vpop.f32.mrf.mxu0 }
  0xcb   :  { %v187_v16 = vadd.f32 %v3149_v21, %v186_v15  ;;  %369 = vmatpush.bf16.msra.mxu1 %v360_v12  ;;  %3001 = vmatpush.bf16.msra.mxu2 %v360_v12  ;;  %v353_v7 = vpack.c.b16 %v338_v5, %v337_v6  ;;  %v3280_v12 = vld [vmem:[%s4398_s1 + $0x8] sm:$0xff]  ;;  %v3295_v15 = vld [vmem:[%s4398_s1 + $0x10] sm:$0xff] }
  0xcc   :  { %4521 = vst [vmem:[#allocation16_spill] sm:$0xff] %v3280_v12 }
  0xcd   :  { %v3224_v19 = vmax.f32 %v187_v16, 0.0  ;;  %4524 = vst [vmem:[#allocation19_spill] sm:$0xff] %v3295_v15  ;;  %v3300_v16 = vld [vmem:[%s4398_s1 + $0x30] sm:$0xff] }
  0xce   :  { %4525 = vst [vmem:[#allocation20_spill] sm:$0xff] %v3300_v16  ;;  %v3304_v17 = vld [vmem:[#allocation2 + $0x38] sm:$0xff] }
  0xcf   :  { %v2968_v23 = vpack.c.bf16 %v3224_v19, %v3222_v18  ;;  %370 = vmatpush.bf16.msra.mxu1 %v359_v20  ;;  %3002 = vmatpush.bf16.msra.mxu2 %v359_v20  ;;  %v232_v40 = vpack.c.bf16 %v3224_v19, %v3224_v19  ;;  %4526 = vst [vmem:[#allocation21_spill] sm:$0xff] %v3304_v17  ;;  %v3310_v20 = vld [vmem:[%s4398_s1 + $0x18] sm:$0xff] }
  0xd0   :  { %4527 = vst [vmem:[#allocation22_spill] sm:$0xff] %v3310_v20 }
  0xd1   :  { %2992 = vst [vmem:[#allocation2 + $0x18] sm:$0xff] %v2968_v23   ;;  %v344_v47 = vunpack.c.l.b16 %v232_v40  ;;  %v2885_v23 = vld [vmem:[#allocation3 + $0x38] sm:$0xff] }
  0xd2   :  { %v189_v25 = vpop.f32.mrf.mxu0 }
  0xd3   :  { %371 = vmatpush.bf16.msra.mxu1 %v358_v24  ;;  %3003 = vmatpush.bf16.msra.mxu2 %v358_v24  ;;  %v190_v27 = vadd.f32 %v3149_v21, %v189_v25  ;;  %v2884_v24 = vld [vmem:[#allocation3 + $0x30] sm:$0xff]  ;;  %v2883_v25 = vld [vmem:[#allocation3 + $0x28] sm:$0xff] }
  0xd5   :  { %v3231_v30 = vmax.f32 %v190_v27, 0.0  ;;  %v2882_v27 = vld [vmem:[#allocation3 + $0x20] sm:$0xff] }
  0xd7   :  { %v233_v36 = vpack.c.bf16 %v3231_v30, %v3231_v30 }
  0xd8   :  { %v3229_v29 = vld [vmem:[#allocation2 + $0x18] sm:$0xff] }
  0xd9   :  { %746 = vmatmul.bf16.gmra.mxu3 %v3229_v29  ;;  %v345_v42 = vunpack.c.l.b16 %v233_v36  ;;  %v2879_v36 = vld [vmem:[#allocation3 + $0x8] sm:$0xff] }
  0xda   :  { %v191_v32 = vpop.f32.mrf.mxu0 }
  0xdb   :  { %v192_v33 = vadd.f32 %v3149_v21, %v191_v32  ;;  %v231_v21 = vpack.c.bf16 %v3222_v18, %v3222_v18  ;;  %v2881_v32 = vld [vmem:[#allocation3 + $0x18] sm:$0xff] }
  0xdd   :  { %v3235_v35 = vmax.f32 %v192_v33, 0.0  ;;  %v343_v50 = vunpack.c.l.b16 %v231_v21  ;;  %v2880_v33 = vld [vmem:[#allocation3 + $0x10] sm:$0xff] }
  0xdf   :  { %v2973_v38 = vpack.c.bf16 %v3235_v35, %v3231_v30  ;;  %v234_v39 = vpack.c.bf16 %v3235_v35, %v3235_v35  ;;  %v356_v53 = vpack.c.b16 %v344_v47, %v343_v50 }
  0xe1   :  { %2993 = vst [vmem:[#allocation2 + $0x20] sm:$0xff] %v2973_v38   ;;  %v346_v44 = vunpack.c.l.b16 %v234_v39  ;;  %v2878_v38 = vld [vmem:[#allocation3] sm:$0xff] }
  0xe3   :  { %v357_v45 = vpack.c.b16 %v346_v44, %v345_v42 }
  0xe5   :  { %372 = vmatpush.bf16.msra.mxu1 %v357_v45  ;;  %3004 = vmatpush.bf16.msra.mxu2 %v357_v45 }
  0xe8   :  { %v3253_v56 = vld [vmem:[#allocation2 + $0x20] sm:$0xff] }
  0xe9   :  { %373 = vmatpush.bf16.msra.mxu1 %v356_v53  ;;  %3005 = vmatpush.bf16.msra.mxu2 %v356_v53 }
  0xea   :  { %751 = vmatmul.bf16.gmra.mxu3 %v3253_v56 }
  0xed   :  { %374 = vmatpush.bf16.msra.mxu1 %v355_v62  ;;  %3006 = vmatpush.bf16.msra.mxu2 %v355_v62 }
  0xf1   :  { %375 = vmatpush.bf16.msra.mxu1 %v354_v4  ;;  %3007 = vmatpush.bf16.msra.mxu2 %v354_v4 }
  0xf5   :  { %376 = vmatpush.bf16.msra.mxu1 %v353_v7  ;;  %3008 = vmatpush.bf16.msra.mxu2 %v353_v7 }
  0xf8   :  { %377 = vmatmul.bf16.vlgmr.msra.gmra.mxu1 %v3265_v9  ;;  %397 = vmatmul.bf16.vlgmr.msra.gmra.mxu2 %v3270_v10 }
  0xf9   :  { %674 = vmatpush.bf16.msrb.mxu2 %v2885_v23 }
  0xfa   :  { %756 = vmatmul.bf16.gmra.mxu3 %v3274_v11 }
  0xfd   :  { %675 = vmatpush.bf16.msrb.mxu2 %v2884_v24 }
 0x101   :  { %676 = vmatpush.bf16.msrb.mxu2 %v2883_v25 }
 0x105   :  { %677 = vmatpush.bf16.msrb.mxu2 %v2882_v27 }
 0x108   :  { %382 = vmatmul.bf16.gmra.mxu1 %v3280_v12  ;;  %402 = vmatmul.bf16.gmra.mxu2 %v3285_v13 }
 0x109   :  { %678 = vmatpush.bf16.msrb.mxu2 %v2881_v32 }
 0x10a   :  { %761 = vmatmul.bf16.gmra.mxu3 %v3289_v14 }
 0x10d   :  { %679 = vmatpush.bf16.msrb.mxu2 %v2880_v33 }
 0x111   :  { %680 = vmatpush.bf16.msrb.mxu2 %v2879_v36 }
 0x115   :  { %681 = vmatpush.bf16.msrb.mxu2 %v2878_v38 }
 0x118   :  { %387 = vmatmul.bf16.gmra.mxu1 %v3295_v15  ;;  %407 = vmatmul.bf16.gmra.mxu2 %v3300_v16 }
 0x11a   :  { %766 = vmatmul.bf16.gmra.mxu3 %v3304_v17 }
 0x128   :  { %392 = vmatmul.bf16.gmra.mxu1 %v3310_v20  ;;  %412 = vmatmul.bf16.gmra.mxu2 %v3315_v22 }
 0x175   :  { %v3319_v39 = vpop.f32.mrf.mxu1 }
 0x176   :  { %v434_v40 = vpack.c.bf16 %v3319_v39, %v3319_v39 }
 0x178   :  { %v466_v21 = vunpack.c.l.b16 %v434_v40 }
 0x17b   :  { %v3343_v5 = vpop.f32.mrf.mxu2 }
 0x17c   :  { %v442_v38 = vpack.c.bf16 %v3343_v5, %v3343_v5 }
 0x17d   :  { %v3323_v42 = vpop.f32.mrf.mxu1 }
 0x17e   :  { %v435_v44 = vpack.c.bf16 %v3323_v42, %v3323_v42 }
 0x180   :  { %v467_v45 = vunpack.c.l.b16 %v435_v44  ;;  %v474_v44 = vunpack.c.l.b16 %v442_v38  ;;  %v2903_v38 = vld [vmem:[#allocation3 + $0xc8] sm:$0xff] }
 0x182   :  { %v482_v47 = vpack.c.b16 %v467_v45, %v466_v21 }
 0x183   :  { %v3349_v23 = vpop.f32.mrf.mxu2 }
 0x184   :  { %682 = vmatmul.bf16.vlgmr.msrb.gmra.mxu2 %v482_v47  ;;  %v443_v40 = vpack.c.bf16 %v3349_v23, %v3349_v23 }
 0x185   :  { %v3327_v48 = vpop.f32.mrf.mxu1 }
 0x186   :  { %v436_v50 = vpack.c.bf16 %v3327_v48, %v3327_v48  ;;  %v475_v21 = vunpack.c.l.b16 %v443_v40  ;;  %v774_v22 = vmul.f32 0.3, %v3327_v48 }
 0x188   :  { %v468_v54 = vunpack.c.l.b16 %v436_v50  ;;  %v486_v47 = vpack.c.b16 %v475_v21, %v474_v44  ;;  %v2909_v50 = vld [vmem:[#allocation3 + $0xf8] sm:$0xff]  ;;  %v2902_v21 = vld [vmem:[#allocation3 + $0xc0] sm:$0xff] }
 0x189   :  { %1215 = vmatpush.bf16.msra.mxu2 %v2909_v50 }
 0x18b   :  { %v3355_v36 = vpop.f32.mrf.mxu2 }
 0x18d   :  { %v3331_v51 = vpop.f32.mrf.mxu1 }
 0x18e   :  { %v437_v53 = vpack.c.bf16 %v3331_v51, %v3331_v51 }
 0x190   :  { %v469_v55 = vunpack.c.l.b16 %v437_v53  ;;  %v2908_v53 = vld [vmem:[#allocation3 + $0xf0] sm:$0xff] }
 0x191   :  { %1216 = vmatpush.bf16.msra.mxu2 %v2908_v53  ;;  %v732_v53 = vpop.f32.mrf.mxu3 }
 0x192   :  { %v483_v60 = vpack.c.b16 %v469_v55, %v468_v54  ;;  %v444_v54 = vpack.c.bf16 %v3355_v36, %v3355_v36 }
 0x193   :  { %v3361_v45 = vpop.f32.mrf.mxu2 }
 0x194   :  { %687 = vmatmul.bf16.gmra.mxu2 %v483_v60  ;;  %v445_v55 = vpack.c.bf16 %v3361_v45, %v3361_v45  ;;  %v2907_v60 = vld [vmem:[#allocation3 + $0xe8] sm:$0xff] }
 0x195   :  { %v3335_v61 = vpop.f32.mrf.mxu1  ;;  %1217 = vmatpush.bf16.msra.mxu2 %v2907_v60 }
 0x196   :  { %v438_v62 = vpack.c.bf16 %v3335_v61, %v3335_v61 }
 0x198   :  { %v470_v2 = vunpack.c.l.b16 %v438_v62 }
 0x19b   :  { %v3367_v62 = vpop.f32.mrf.mxu2 }
 0x19d   :  { %v3339_v63 = vpop.f32.mrf.mxu1 }
 0x19e   :  { %v439_v0 = vpack.c.bf16 %v3339_v63, %v3339_v63 }
 0x1a0   :  { %v471_v3 = vunpack.c.l.b16 %v439_v0  ;;  %v476_v0 = vunpack.c.l.b16 %v444_v54 }
 0x1a2   :  { %v484_v4 = vpack.c.b16 %v471_v3, %v470_v2  ;;  %v477_v2 = vunpack.c.l.b16 %v445_v55  ;;  %v2906_v3 = vld [vmem:[#allocation3 + $0xe0] sm:$0xff] }
 0x1a3   :  { %1218 = vmatpush.bf16.msra.mxu2 %v2906_v3 }
 0x1a4   :  { %692 = vmatmul.bf16.gmra.mxu2 %v484_v4  ;;  %v487_v4 = vpack.c.b16 %v477_v2, %v476_v0 }
 0x1a5   :  { %v3345_v6 = vpop.f32.mrf.mxu1 }
 0x1a6   :  { %v440_v7 = vpack.c.bf16 %v3345_v6, %v3345_v6 }
 0x1a8   :  { %v472_v27 = vunpack.c.l.b16 %v440_v7  ;;  %v2905_v7 = vld [vmem:[#allocation3 + $0xd8] sm:$0xff] }
 0x1a9   :  { %1219 = vmatpush.bf16.msra.mxu2 %v2905_v7 }
 0x1ad   :  { %v3351_v24 = vpop.f32.mrf.mxu1 }
 0x1ae   :  { %v441_v25 = vpack.c.bf16 %v3351_v24, %v3351_v24 }
 0x1b0   :  { %v473_v32 = vunpack.c.l.b16 %v441_v25  ;;  %v3369_v25 = vpop.f32.mrf.mxu2 }
 0x1b2   :  { %v485_v33 = vpack.c.b16 %v473_v32, %v472_v27  ;;  %v2904_v27 = vld [vmem:[#allocation3 + $0xd0] sm:$0xff]  ;;  %v446_v32 = vpack.c.bf16 %v3367_v62, %v3367_v62 }
 0x1b3   :  { %1220 = vmatpush.bf16.msra.mxu2 %v2904_v27  ;;  %v3385_v27 = vld [vmem:[#allocation2] sm:$0xff]  }
 0x1b4   :  { %697 = vmatmul.bf16.gmra.mxu2 %v485_v33  ;;  %v447_v33 = vpack.c.bf16 %v3369_v25, %v3369_v25  ;;  %v478_v40 = vunpack.c.l.b16 %v446_v32  ;;  %v788_v32 = vunpack.c.l.bf16 %v3385_v27 }
 0x1b6   :  { %v479_v44 = vunpack.c.l.b16 %v447_v33  ;;  %v772_v33 = vmul.f32 0.3, %v3319_v39 }
 0x1b7   :  { %1221 = vmatpush.bf16.msra.mxu2 %v2903_v38  ;;  %v3389_v38 = vmul.f32 0.7, %v788_v32 }
 0x1b8   :  { %v488_v50 = vpack.c.b16 %v479_v44, %v478_v40 }
 0x1b9   :  { %4529 = vst [vmem:[#allocation24_spill] sm:$0xff] %v3389_v38  ;;  %v820_v40 = vadd.f32 %v3389_v38, %v772_v33  ;;  %v3411_v38 = vld [vmem:[#allocation2 + $0x10] sm:$0xff]  }
 0x1ba   :  { %v792_v48 = vunpack.c.l.bf16 %v3411_v38 }
 0x1bb   :  { %1222 = vmatpush.bf16.msra.mxu2 %v2902_v21 }
 0x1bc   :  { %v3417_v13 = vmul.f32 0.7, %v792_v48  ;;  %v778_v48 = vmul.f32 0.3, %v3345_v6  ;;  %v780_v6 = vmul.f32 0.3, %v3343_v5 }
 0x1be   :  { %4533 = vst [vmem:[#allocation28_spill] sm:$0xff] %v3417_v13 }
 0x1c4   :  { %702 = vmatmul.bf16.gmra.mxu2 %v486_v47  ;;  %v3375_v47 = vpop.f32.mrf.mxu2 }
 0x1c5   :  { %v448_v55 = vpack.c.bf16 %v3375_v47, %v3375_v47 }
 0x1c7   :  { %v480_v0 = vunpack.c.l.b16 %v448_v55  ;;  %v852_v55 = vmul.f32 0.08370927, %v820_v40 }
 0x1cc   :  { %v3377_v54 = vpop.f32.mrf.mxu2 }
 0x1cd   :  { %v449_v60 = vpack.c.bf16 %v3377_v54, %v3377_v54 }
 0x1cf   :  { %v481_v2 = vunpack.c.l.b16 %v449_v60 }
 0x1d1   :  { %v489_v3 = vpack.c.b16 %v481_v2, %v480_v0  ;;  %v3397_v2 = vld [vmem:[#allocation2 + $0x8] sm:$0xff]  }
 0x1d2   :  { %v790_v39 = vunpack.c.l.bf16 %v3397_v2 }
 0x1d4   :  { %707 = vmatmul.bf16.gmra.mxu2 %v487_v4  ;;  %v3383_v4 = vpop.f32.mrf.mxu3 }
 0x1dc   :  { %v737_v7 = vpop.f32.mrf.mxu3 }
 0x1e4   :  { %712 = vmatmul.bf16.gmra.mxu2 %v488_v50  ;;  %v3393_v44 = vpop.f32.mrf.mxu3 }
 0x1ec   :  { %v742_v32 = vpop.f32.mrf.mxu3 }
 0x1f4   :  { %717 = vmatmul.bf16.gmra.mxu2 %v489_v3 }
 0x204   :  { %1223 = vmatmul.bf16.vlgmr.msra.gmra.mxu2 %v3167_v37  ;;  %v3403_v37 = vmul.f32 0.7, %v790_v39  ;;  %v776_v39 = vmul.f32 0.3, %v3335_v61 }
 0x206   :  { %4531 = vst [vmem:[#allocation26_spill] sm:$0xff] %v3403_v37  ;;  %v822_v33 = vadd.f32 %v3403_v37, %v774_v22  ;;  %v824_v22 = vadd.f32 %v3417_v13, %v776_v39  ;;  %v3437_v13 = vld [vmem:[#allocation2 + $0x20] sm:$0xff]  }
 0x207   :  { %v683_v21 = vpop.f32.mrf.mxu2  ;;  %v796_v15 = vunpack.c.l.bf16 %v3437_v13 }
 0x208   :  { %v733_v50 = vadd.f32 %v732_v53, %v683_v21  ;;  %v854_v21 = vmul.f32 0.08370927, %v822_v33 }
 0x20a   :  { %v836_v60 = vmul.f32 0.91629076, %v733_v50 }
 0x20c   :  { %v3395_v0 = vadd.f32 %v852_v55, %v836_v60  ;;  %v3407_v55 = vpop.f32.mrf.mxu3 }
 0x20e   :  { %4530 = vst [vmem:[#allocation25_spill] sm:$0xff] %v3395_v0 }
 0x20f   :  { %v3399_v3 = vpop.f32.mrf.mxu2 }
 0x214   :  { %1228 = vmatmul.bf16.gmra.mxu2 %v3186_v52  ;;  %v747_v52 = vpop.f32.mrf.mxu3 }
 0x217   :  { %v688_v53 = vpop.f32.mrf.mxu2 }
 0x218   :  { %v738_v40 = vadd.f32 %v737_v7, %v688_v53  ;;  %v856_v53 = vmul.f32 0.08370927, %v824_v22 }
 0x21a   :  { %v838_v50 = vmul.f32 0.91629076, %v738_v40 }
 0x21c   :  { %v3409_v60 = vadd.f32 %v854_v21, %v838_v50  ;;  %v3423_v50 = vld [vmem:[#allocation2 + $0x18] sm:$0xff]   ;;  %v3425_v37 = vpop.f32.mrf.mxu3 }
 0x21d   :  { %v794_v61 = vunpack.c.l.bf16 %v3423_v50 }
 0x21e   :  { %4532 = vst [vmem:[#allocation27_spill] sm:$0xff] %v3409_v60 }
 0x21f   :  { %v3413_v16 = vpop.f32.mrf.mxu2 }
 0x224   :  { %1233 = vmatmul.bf16.gmra.mxu2 %v3213_v8  ;;  %v3431_v8 = vmul.f32 0.7, %v794_v61 }
 0x226   :  { %4535 = vst [vmem:[#allocation30_spill] sm:$0xff] %v3431_v8 }
 0x227   :  { %v693_v7 = vpop.f32.mrf.mxu2 }
 0x228   :  { %v743_v33 = vadd.f32 %v742_v32, %v693_v7  ;;  %v826_v32 = vadd.f32 %v3431_v8, %v778_v48  ;;  %v752_v7 = vpop.f32.mrf.mxu3 }
 0x22a   :  { %v840_v40 = vmul.f32 0.91629076, %v743_v33  ;;  %v858_v33 = vmul.f32 0.08370927, %v826_v32 }
 0x22c   :  { %v3421_v21 = vadd.f32 %v856_v53, %v840_v40 }
 0x22e   :  { %4534 = vst [vmem:[#allocation29_spill] sm:$0xff] %v3421_v21  ;;  %v784_v21 = vmul.f32 0.3, %v3367_v62 }
 0x22f   :  { %v3427_v10 = vpop.f32.mrf.mxu2 }
 0x230   :  { %v3443_v61 = vpop.f32.mrf.mxu3 }
 0x234   :  { %1238 = vmatmul.bf16.gmra.mxu2 %v3229_v29  ;;  %v3445_v29 = vmul.f32 0.7, %v796_v15 }
 0x236   :  { %4537 = vst [vmem:[#allocation32_spill] sm:$0xff] %v3445_v29 }
 0x237   :  { %v698_v39 = vpop.f32.mrf.mxu2 }
 0x238   :  { %v748_v22 = vadd.f32 %v747_v52, %v698_v39  ;;  %v828_v52 = vadd.f32 %v3445_v29, %v780_v6  ;;  %v432_v6 = vld [vmem:[#allocation2 + $0x38] sm:$0xff]   ;;  %v430_v29 = vld [vmem:[#allocation2 + $0x30] sm:$0xff]  }
 0x239   :  { %v803_v28 = vunpack.c.h.bf16 %v432_v6 }
 0x23a   :  { %v842_v53 = vmul.f32 0.91629076, %v748_v22  ;;  %v860_v39 = vmul.f32 0.08370927, %v828_v52  ;;  %v428_v52 = vld [vmem:[#allocation2 + $0x28] sm:$0xff]  }
 0x23b   :  { %v799_v41 = vunpack.c.h.bf16 %v428_v52  ;;  %v798_v59 = vunpack.c.l.bf16 %v428_v52 }
 0x23c   :  { %v3435_v40 = vadd.f32 %v858_v33, %v842_v53  ;;  %v757_v53 = vpop.f32.mrf.mxu3 }
 0x23e   :  { %4536 = vst [vmem:[#allocation31_spill] sm:$0xff] %v3435_v40 }
 0x23f   :  { %v3439_v20 = vpop.f32.mrf.mxu2 }
 0x244   :  { %1243 = vmatmul.bf16.gmra.mxu2 %v3253_v56  ;;  %v759_v12 = vpop.f32.mrf.mxu3 }
 0x247   :  { %v703_v48 = vpop.f32.mrf.mxu2 }
 0x248   :  { %v753_v32 = vadd.f32 %v752_v7, %v703_v48  ;;  %v802_v7 = vunpack.c.l.bf16 %v432_v6  ;;  %v3467_v6 = vmul.f32 0.7, %v803_v28  ;;  %v781_v28 = vmul.f32 0.3, %v3349_v23 }
 0x24a   :  { %v844_v22 = vmul.f32 0.91629076, %v753_v32  ;;  %v801_v32 = vunpack.c.h.bf16 %v430_v29 }
 0x24c   :  { %v3449_v33 = vadd.f32 %v860_v39, %v844_v22  ;;  %v762_v0 = vpop.f32.mrf.mxu3  ;;  %v786_v39 = vmul.f32 0.3, %v3375_v47  ;;  %v800_v22 = vunpack.c.l.bf16 %v430_v29  ;;  %v3459_v57 = vmul.f32 0.7, %v801_v32 }
 0x24d   :  { %v783_v47 = vmul.f32 0.3, %v3361_v45 }
 0x24e   :  { %v3464_v29 = vmul.f32 0.7, %v800_v22 }
 0x24f   :  { %v705_v8 = vpop.f32.mrf.mxu2 }
 0x250   :  { %4539 = vst [vmem:[#allocation34_spill] sm:$0xff] %v3464_v29  ;;  %v832_v52 = vadd.f32 %v3464_v29, %v784_v21 }
 0x254   :  { %1248 = vmatmul.bf16.gmra.mxu2 %v3274_v11  ;;  %v764_v56 = vpop.f32.mrf.mxu3  ;;  %v785_v11 = vmul.f32 0.3, %v3369_v25 }
 0x256   :  { %v833_v25 = vadd.f32 %v3459_v57, %v785_v11 }
 0x257   :  { %v708_v5 = vpop.f32.mrf.mxu2 }
 0x258   :  { %v865_v11 = vmul.f32 0.08370927, %v833_v25 }
 0x25c   :  { %v767_v48 = vpop.f32.mrf.mxu3 }
 0x25f   :  { %v710_v9 = vpop.f32.mrf.mxu2 }
 0x260   :  { %v760_v32 = vadd.f32 %v759_v12, %v710_v9 }
 0x262   :  { %v847_v12 = vmul.f32 0.91629076, %v760_v32 }
 0x264   :  { %1253 = vmatmul.bf16.gmra.mxu2 %v3289_v14  ;;  %v3456_v14 = vmul.f32 0.7, %v802_v7  ;;  %v3469_v7 = vmul.f32 0.7, %v799_v41 }
 0x266   :  { %4538 = vst [vmem:[#allocation33_spill] sm:$0xff] %v3456_v14  ;;  %v834_v40 = vadd.f32 %v3456_v14, %v786_v39  ;;  %v831_v41 = vadd.f32 %v3469_v7, %v783_v47 }
 0x267   :  { %v713_v15 = vpop.f32.mrf.mxu2 }
 0x268   :  { %v866_v45 = vmul.f32 0.08370927, %v834_v40  ;;  %v863_v25 = vmul.f32 0.08370927, %v831_v41 }
 0x26f   :  { %v715_v26 = vpop.f32.mrf.mxu2 }
 0x270   :  { %v765_v18 = vadd.f32 %v764_v56, %v715_v26  ;;  %v3475_v56 = vmul.f32 0.7, %v798_v59 }
 0x272   :  { %v849_v39 = vmul.f32 0.91629076, %v765_v18  ;;  %v755_v18 = vadd.f32 %v3443_v61, %v705_v8  ;;  %v750_v8 = vadd.f32 %v3425_v37, %v3439_v20  ;;  %v791_v37 = vunpack.c.h.bf16 %v3397_v2 }
 0x274   :  { %1258 = vmatmul.bf16.gmra.mxu2 %v3304_v17  ;;  %v787_v17 = vmul.f32 0.3, %v3377_v54  ;;  %v782_v54 = vmul.f32 0.3, %v3355_v36  ;;  %v881_v23 = vadd.f32 %v865_v11, %v849_v39  ;;  %v845_v61 = vmul.f32 0.91629076, %v755_v18 }
 0x275   :  { %v843_v11 = vmul.f32 0.91629076, %v750_v8 }
 0x276   :  { %v835_v26 = vadd.f32 %v3467_v6, %v787_v17  ;;  %v830_v59 = vadd.f32 %v3475_v56, %v782_v54  ;;  %v864_v17 = vmul.f32 0.08370927, %v832_v52  ;;  %v793_v54 = vunpack.c.h.bf16 %v3411_v38 }
 0x277   :  { %v718_v60 = vpop.f32.mrf.mxu2 }
 0x278   :  { %v768_v43 = vadd.f32 %v767_v48, %v718_v60  ;;  %v763_v60 = vadd.f32 %v762_v0, %v713_v15  ;;  %v797_v48 = vunpack.c.h.bf16 %v3437_v13  ;;  %v769_v0 = vpop.f32.mrf.mxu3  ;;  %v758_v15 = vadd.f32 %v757_v53, %v708_v5 }
 0x279   :  { %v867_v9 = vmul.f32 0.08370927, %v835_v26  ;;  %v879_v26 = vadd.f32 %v863_v25, %v847_v12 }
 0x27a   :  { %v850_v62 = vmul.f32 0.91629076, %v768_v43  ;;  %v795_v43 = vunpack.c.h.bf16 %v3423_v50  ;;  %v848_v36 = vmul.f32 0.91629076, %v763_v60  ;;  %v3480_v29 = vmul.f32 0.7, %v797_v48 }
 0x27b   :  { %v779_v50 = vmul.f32 0.3, %v3351_v24  ;;  %v846_v53 = vmul.f32 0.91629076, %v758_v15  ;;  %v862_v48 = vmul.f32 0.08370927, %v830_v59  ;;  %v3498_v24 = vadd.f32 %v881_v23, %v3182_v49 }
 0x27c   :  { %v882_v22 = vadd.f32 %v866_v45, %v850_v62  ;;  %v829_v47 = vadd.f32 %v3480_v29, %v781_v28  ;;  %v880_v5 = vadd.f32 %v864_v17, %v848_v36  ;;  %v3490_v52 = vmul.f32 0.7, %v795_v43 }
 0x27d   :  { %v878_v28 = vadd.f32 %v862_v48, %v846_v53  ;;  %v745_v49 = vadd.f32 %v3407_v55, %v3427_v10  ;;  %v4449_v43 = vmax.f32 %v3498_v24, 0.0  ;;  %v789_v36 = vunpack.c.h.bf16 %v3385_v27  ;;  %v4541_v53 = vld [vmem:[#allocation12_spill] sm:$0xff] }
 0x27e   :  { %v3487_v62 = vadd.f32 %v882_v22, %v3194_v58  ;;  %v861_v32 = vmul.f32 0.08370927, %v829_v47  ;;  %v777_v58 = vmul.f32 0.3, %v3339_v63  ;;  %v827_v39 = vadd.f32 %v3490_v52, %v779_v50 }
 0x27f   :  { %v720_v13 = vpop.f32.mrf.mxu2  ;;  %v3505_v20 = vadd.f32 %v880_v5, %v3179_v46  ;;  %v775_v46 = vmul.f32 0.3, %v3331_v51  ;;  %v3524_v55 = vadd.f32 %v878_v28, %v3160_v31  ;;  %v3527_v22 = vmul.f32 0.7, %v791_v37 }
 0x280   :  { %v770_v21 = vadd.f32 %v769_v0, %v720_v13  ;;  %v4450_v38 = vmax.f32 %v3487_v62, 0.0  ;;  %v877_v0 = vadd.f32 %v861_v32, %v845_v61  ;;  %v3518_v13 = vadd.f32 %v879_v26, %v3163_v34  ;;  %v4546_v32 = vld [vmem:[#allocation10_spill] sm:$0xff] }
 0x281   :  { %v859_v15 = vmul.f32 0.08370927, %v827_v39  ;;  %v4447_v10 = vmax.f32 %v3505_v20, 0.0  ;;  %v841_v34 = vmul.f32 0.91629076, %v745_v49  ;;  %v823_v27 = vadd.f32 %v3527_v22, %v775_v46  ;;  %v4551_v46 = vld [vmem:[#allocation8_spill] sm:$0xff] }
 0x282   :  { %v851_v40 = vmul.f32 0.91629076, %v770_v21  ;;  %v740_v21 = vadd.f32 %v3393_v44, %v3413_v16  ;;  %v4446_v17 = vmax.f32 %v3518_v13, 0.0  ;;  %v773_v31 = vmul.f32 0.3, %v3323_v42 }
 0x283   :  { %v875_v59 = vadd.f32 %v859_v15, %v843_v11  ;;  %v922_v51 = vpack.c.bf16 %v4449_v43, %v4447_v10  ;;  %v4445_v16 = vmax.f32 %v3524_v55, 0.0  ;;  %v3544_v44 = vadd.f32 %v3449_v33, %v3231_v30  ;;  %v4549_v11 = vld [vmem:[#allocation9_spill] sm:$0xff] }
 0x284   :  { %v883_v60 = vadd.f32 %v867_v9, %v851_v40  ;;  %v3537_v9 = vadd.f32 %v877_v0, %v3235_v35  ;;  %v3546_v12 = vmul.f32 0.7, %v789_v36  ;;  %v735_v23 = vadd.f32 %v3383_v4, %v3399_v3  ;;  %v4542_v4 = vld [vmem:[#allocation31_spill] sm:$0xff] }
 0x285   :  { %v839_v40 = vmul.f32 0.91629076, %v740_v21  ;;  %v921_v42 = vpack.c.bf16 %v4446_v17, %v4445_v16  ;;  %v3556_v25 = vadd.f32 %v875_v59, %v3224_v19  ;;  %v855_v33 = vmul.f32 0.08370927, %v823_v27  ;;  %v4557_v27 = vld [vmem:[#allocation25_spill] sm:$0xff]  ;;  %v3691_v16 = vld [vmem:[#allocation2] sm:$0xff] }
 0x286   :  { %v3495_v45 = vadd.f32 %v883_v60, %v3203_v1  ;;  %v3508_v1 = vmul.f32 0.7, %v793_v54  ;;  %4540 = vst [vmem:[#allocation35_spill] sm:$0xff] %v3546_v12  ;;  %v4444_v47 = vmax.f32 %v3537_v9, 0.0  ;;  %v821_v30 = vadd.f32 %v3546_v12, %v773_v31  ;;  %v4544_v54 = vld [vmem:[#allocation11_spill] sm:$0xff]  ;;  %v4556_v31 = vld [vmem:[#allocation6_spill] sm:$0xff] }
 0x287   :  { %v4443_v50 = vmax.f32 %v3544_v44, 0.0  ;;  %v3562_v3 = vadd.f32 %v4542_v4, %v4541_v53  ;;  %v837_v5 = vmul.f32 0.91629076, %v735_v23  ;;  %v871_v60 = vadd.f32 %v855_v33, %v839_v40  ;;  %v4560_v33 = vld [vmem:[#allocation16_spill] sm:$0xff]  ;;  %v4561_v53 = vld [vmem:[#allocation19_spill] sm:$0xff]  ;;  %v4562_v4 = vld [vmem:[#allocation22_spill] sm:$0xff] }
 0x288   :  { %v4448_v41 = vmax.f32 %v3495_v45, 0.0  ;;  %v825_v2 = vadd.f32 %v3508_v1, %v777_v58  ;;  %v4442_v19 = vmax.f32 %v3556_v25, 0.0  ;;  %v853_v61 = vmul.f32 0.08370927, %v821_v30  ;;  %v4547_v58 = vld [vmem:[#allocation29_spill] sm:$0xff] }
 0x289   :  { %4543 = vst [vmem:[#allocation12_spill] sm:$0xff] %v3562_v3  ;;  %v920_v48 = vpack.c.bf16 %v4444_v47, %v4443_v50  ;;  %v4441_v26 = vmax.f32 %v3562_v3, 0.0  ;;  %v3575_v39 = vadd.f32 %v4547_v58, %v4546_v32  ;;  %v3583_v0 = vadd.f32 %v871_v60, %v4549_v11  ;;  %v4559_v30 = vld [vmem:[#allocation13_spill] sm:$0xff]  ;;  %v2898_v32 = vld [vmem:[#allocation3 + $0xa0] sm:$0xff]  ;;  %v2895_v11 = vld [vmem:[#allocation3 + $0x88] sm:$0xff] }
 0x28a   :  { %v923_v63 = vpack.c.bf16 %v4448_v41, %v4450_v38  ;;  %v857_v18 = vmul.f32 0.08370927, %v825_v2  ;;  %v869_v28 = vadd.f32 %v853_v61, %v837_v5  ;;  %v4552_v2 = vld [vmem:[#allocation27_spill] sm:$0xff]  ;;  %v4563_v5 = vld [vmem:[#allocation14_spill] sm:$0xff]  ;;  %v2901_v60 = vld [vmem:[#allocation3 + $0xb8] sm:$0xff] }
 0x28b   :  { %4548 = vst [vmem:[#allocation11_spill] sm:$0xff] %v3575_v39  ;;  %v919_v37 = vpack.c.bf16 %v4442_v19, %v4441_v26  ;;  %v3588_v15 = vadd.f32 %v4552_v2, %v4551_v46  ;;  %v4438_v21 = vmax.f32 %v3583_v0, 0.0  ;;  %1166 = vmatpush.bf16.msrb.mxu1 %v2901_v60  ;;  %v2899_v61 = vld [vmem:[#allocation3 + $0xa8] sm:$0xff]  ;;  %v2897_v58 = vld [vmem:[#allocation3 + $0x98] sm:$0xff]  ;;  %v2894_v46 = vld [vmem:[#allocation3 + $0x80] sm:$0xff] }
 0x28c   :  { %924 = vmatpush.bf16.msrb.mxu0 %v923_v63  ;;  %v873_v35 = vadd.f32 %v857_v18, %v841_v34  ;;  %4550 = vst [vmem:[#allocation10_spill] sm:$0xff] %v3583_v0  ;;  %v4439_v63 = vmax.f32 %v3575_v39, 0.0  ;;  %v4554_v34 = vld [vmem:[#allocation7_spill] sm:$0xff]  ;;  %v3601_v18 = vadd.f32 %v4557_v27, %v4556_v31 }
 0x28d   :  { %4553 = vst [vmem:[#allocation29_spill] sm:$0xff] %v3588_v15  ;;  %v3596_v59 = vadd.f32 %v869_v28, %v4554_v34  ;;  %v4565_v28 = vld [vmem:[#allocation20_spill] sm:$0xff]  ;;  %v4566_v2 = vld [vmem:[#allocation23_spill] sm:$0xff] }
 0x28e   :  { %v3570_v8 = vadd.f32 %v873_v35, %v4544_v54  ;;  %4558 = vst [vmem:[#allocation8_spill] sm:$0xff] %v3601_v18  ;;  %v4435_v35 = vmax.f32 %v3601_v18, 0.0  ;;  %v2900_v54 = vld [vmem:[#allocation3 + $0xb0] sm:$0xff]  ;;  %v4581_v18 = vld [vmem:[#allocation15_spill] sm:$0xff] }
 0x28f   :  { %4555 = vst [vmem:[#allocation9_spill] sm:$0xff] %v3596_v59  ;;  %v4436_v40 = vmax.f32 %v3596_v59, 0.0  ;;  %1167 = vmatpush.bf16.msrb.mxu1 %v2900_v54 }
 0x290   :  { %925 = vmatpush.bf16.msrb.mxu0 %v922_v51  ;;  %4545 = vst [vmem:[#allocation31_spill] sm:$0xff] %v3570_v8  ;;  %v4440_v49 = vmax.f32 %v3570_v8, 0.0  ;;  %v4437_v51 = vmax.f32 %v3588_v15, 0.0 }
 0x291   :  { %4568 = vst [vmem:[#allocation27_spill] sm:$0xff] %v3691_v16 }
 0x292   :  { %v918_v36 = vpack.c.bf16 %v4440_v49, %v4439_v63  ;;  %v917_v23 = vpack.c.bf16 %v4438_v21, %v4437_v51 }
 0x293   :  { %1168 = vmatpush.bf16.msrb.mxu1 %v2899_v61 }
 0x294   :  { %926 = vmatpush.bf16.msrb.mxu0 %v921_v42  ;;  %v916_v42 = vpack.c.bf16 %v4436_v40, %v4435_v35  ;;  %v2919_v35 = vld [vmem:[#allocation3 + $0x148] sm:$0xff] }
 0x297   :  { %1169 = vmatpush.bf16.msrb.mxu1 %v2898_v32 }
 0x298   :  { %927 = vmatpush.bf16.msrb.mxu0 %v920_v48  ;;  %v4564_v48 = vld [vmem:[#allocation17_spill] sm:$0xff] }
 0x29b   :  { %1170 = vmatpush.bf16.msrb.mxu1 %v2897_v58 }
 0x29c   :  { %928 = vmatpush.bf16.msrb.mxu0 %v919_v37  ;;  %v2896_v37 = vld [vmem:[#allocation3 + $0x90] sm:$0xff] }
 0x29f   :  { %1171 = vmatpush.bf16.msrb.mxu1 %v2896_v37 }
 0x2a0   :  { %929 = vmatpush.bf16.msrb.mxu0 %v918_v36 }
 0x2a3   :  { %1172 = vmatpush.bf16.msrb.mxu1 %v2895_v11 }
 0x2a4   :  { %930 = vmatpush.bf16.msrb.mxu0 %v917_v23 }
 0x2a7   :  { %1173 = vmatpush.bf16.msrb.mxu1 %v2894_v46 }
 0x2a8   :  { %931 = vmatpush.bf16.msrb.mxu0 %v916_v42 }
 0x2ab   :  { %932 = vmatmul.bf16.vlgmr.msrb.gmra.mxu0 %v4559_v30 }
 0x2bb   :  { %937 = vmatmul.bf16.gmra.mxu0 %v4560_v33 }
 0x2cb   :  { %942 = vmatmul.bf16.gmra.mxu0 %v4561_v53 }
 0x2db   :  { %947 = vmatmul.bf16.gmra.mxu0 %v4562_v4 }
 0x2eb   :  { %952 = vmatmul.bf16.gmra.mxu0 %v4563_v5 }
 0x2fb   :  { %957 = vmatmul.bf16.gmra.mxu0 %v4564_v48 }
 0x30b   :  { %962 = vmatmul.bf16.gmra.mxu0 %v4565_v28 }
 0x31b   :  { %967 = vmatmul.bf16.gmra.mxu0 %v4566_v2 }
 0x328   :  { %v3621_v36 = vpop.f32.mrf.mxu0 }
 0x329   :  { %v973_v34 = vpack.c.bf16 %v3621_v36, %v3621_v36 }
 0x32b   :  { %v1005_v23 = vunpack.c.l.b16 %v973_v34 }
 0x330   :  { %v3625_v31 = vpop.f32.mrf.mxu0 }
 0x331   :  { %v974_v27 = vpack.c.bf16 %v3625_v31, %v3625_v31 }
 0x333   :  { %v1006_v42 = vunpack.c.l.b16 %v974_v27 }
 0x335   :  { %v1021_v30 = vpack.c.b16 %v1006_v42, %v1005_v23 }
 0x337   :  { %1174 = vmatmul.bf16.vlgmr.msrb.gmra.mxu1 %v1021_v30 }
 0x338   :  { %v3629_v33 = vpop.f32.mrf.mxu0 }
 0x339   :  { %v975_v53 = vpack.c.bf16 %v3629_v33, %v3629_v33 }
 0x33b   :  { %v1007_v60 = vunpack.c.l.b16 %v975_v53 }
 0x340   :  { %v3633_v4 = vpop.f32.mrf.mxu0 }
 0x341   :  { %v976_v5 = vpack.c.bf16 %v3633_v4, %v3633_v4 }
 0x343   :  { %v1008_v48 = vunpack.c.l.b16 %v976_v5 }
 0x345   :  { %v1022_v54 = vpack.c.b16 %v1008_v48, %v1007_v60 }
 0x347   :  { %1179 = vmatmul.bf16.gmra.mxu1 %v1022_v54 }
 0x348   :  { %v3637_v61 = vpop.f32.mrf.mxu0 }
 0x349   :  { %v977_v32 = vpack.c.bf16 %v3637_v61, %v3637_v61 }
 0x34b   :  { %v1009_v37 = vunpack.c.l.b16 %v977_v32 }
 0x350   :  { %v3641_v58 = vpop.f32.mrf.mxu0 }
 0x351   :  { %v978_v28 = vpack.c.bf16 %v3641_v58, %v3641_v58 }
 0x353   :  { %v1010_v11 = vunpack.c.l.b16 %v978_v28 }
 0x355   :  { %v1023_v46 = vpack.c.b16 %v1010_v11, %v1009_v37  ;;  %v2925_v11 = vld [vmem:[#allocation3 + $0x178] sm:$0xff] }
 0x356   :  { %1675 = vmatpush.bf16.msra.mxu1 %v2925_v11 }
 0x357   :  { %1184 = vmatmul.bf16.gmra.mxu1 %v1023_v46 }
 0x358   :  { %v3645_v2 = vpop.f32.mrf.mxu0 }
 0x359   :  { %v979_v34 = vpack.c.bf16 %v3645_v2, %v3645_v2 }
 0x35b   :  { %v1011_v42 = vunpack.c.l.b16 %v979_v34  ;;  %v2924_v34 = vld [vmem:[#allocation3 + $0x170] sm:$0xff] }
 0x35c   :  { %1676 = vmatpush.bf16.msra.mxu1 %v2924_v34  ;;  %v2920_v34 = vld [vmem:[#allocation3 + $0x150] sm:$0xff] }
 0x360   :  { %v3649_v27 = vpop.f32.mrf.mxu0 }
 0x361   :  { %v980_v23 = vpack.c.bf16 %v3649_v27, %v3649_v27 }
 0x363   :  { %v1012_v30 = vunpack.c.l.b16 %v980_v23 }
 0x365   :  { %v1024_v53 = vpack.c.b16 %v1012_v30, %v1011_v42  ;;  %v2923_v42 = vld [vmem:[#allocation3 + $0x168] sm:$0xff] }
 0x366   :  { %1677 = vmatpush.bf16.msra.mxu1 %v2923_v42 }
 0x367   :  { %1189 = vmatmul.bf16.gmra.mxu1 %v1024_v53 }
 0x368   :  { %v3653_v5 = vpop.f32.mrf.mxu0 }
 0x369   :  { %v981_v60 = vpack.c.bf16 %v3653_v5, %v3653_v5 }
 0x36b   :  { %v1013_v32 = vunpack.c.l.b16 %v981_v60 }
 0x370   :  { %v3657_v48 = vpop.f32.mrf.mxu0 }
 0x371   :  { %v982_v54 = vpack.c.bf16 %v3657_v48, %v3657_v48 }
 0x373   :  { %v1014_v28 = vunpack.c.l.b16 %v982_v54 }
 0x375   :  { %v1025_v37 = vpack.c.b16 %v1014_v28, %v1013_v32  ;;  %v2922_v32 = vld [vmem:[#allocation3 + $0x160] sm:$0xff] }
 0x376   :  { %1678 = vmatpush.bf16.msra.mxu1 %v2922_v32  ;;  %v1224_v32 = vpop.f32.mrf.mxu2 }
 0x377   :  { %1194 = vmatmul.bf16.gmra.mxu1 %v1025_v37  ;;  %v2921_v37 = vld [vmem:[#allocation3 + $0x158] sm:$0xff] }
 0x378   :  { %v3661_v46 = vpop.f32.mrf.mxu0 }
 0x379   :  { %v983_v23 = vpack.c.bf16 %v3661_v46, %v3661_v46 }
 0x37a   :  { %1679 = vmatpush.bf16.msra.mxu1 %v2921_v37 }
 0x37b   :  { %v1015_v60 = vunpack.c.l.b16 %v983_v23 }
 0x37e   :  { %1680 = vmatpush.bf16.msra.mxu1 %v2920_v34  ;;  %v3681_v34 = vpop.f32.mrf.mxu2 }
 0x380   :  { %v3665_v30 = vpop.f32.mrf.mxu0 }
 0x381   :  { %v984_v53 = vpack.c.bf16 %v3665_v30, %v3665_v30 }
 0x382   :  { %1681 = vmatpush.bf16.msra.mxu1 %v2919_v35 }
 0x383   :  { %v1016_v54 = vunpack.c.l.b16 %v984_v53 }
 0x385   :  { %v1026_v28 = vpack.c.b16 %v1016_v54, %v1015_v60  ;;  %v2918_v60 = vld [vmem:[#allocation3 + $0x140] sm:$0xff] }
 0x386   :  { %1682 = vmatpush.bf16.msra.mxu1 %v2918_v60  ;;  %v4567_v60 = vld [vmem:[#allocation24_spill] sm:$0xff] }
 0x387   :  { %1199 = vmatmul.bf16.gmra.mxu1 %v1026_v28 }
 0x388   :  { %v3669_v11 = vpop.f32.mrf.mxu0 }
 0x389   :  { %v985_v40 = vpack.c.bf16 %v3669_v11, %v3669_v11 }
 0x38b   :  { %v1017_v42 = vunpack.c.l.b16 %v985_v40 }
 0x390   :  { %v3673_v51 = vpop.f32.mrf.mxu0 }
 0x391   :  { %v986_v23 = vpack.c.bf16 %v3673_v51, %v3673_v51 }
 0x393   :  { %v1018_v53 = vunpack.c.l.b16 %v986_v23 }
 0x395   :  { %v1027_v54 = vpack.c.b16 %v1018_v53, %v1017_v42  ;;  %v1229_v42 = vpop.f32.mrf.mxu2  ;;  %v1264_v53 = vmul.f32 0.3, %v3621_v36  ;;  %v4570_v36 = vld [vmem:[#allocation26_spill] sm:$0xff] }
 0x397   :  { %1204 = vmatmul.bf16.gmra.mxu1 %v1027_v54  ;;  %v1280_v54 = vadd.f32 %v1264_v53, %v4567_v60  ;;  %v4579_v60 = vld [vmem:[#allocation32_spill] sm:$0xff] }
 0x398   :  { %v3677_v28 = vpop.f32.mrf.mxu0 }
 0x399   :  { %v987_v37 = vpack.c.bf16 %v3677_v28, %v3677_v28  ;;  %v1312_v50 = vmul.f32 0.4403842, %v1280_v54 }
 0x39b   :  { %v1019_v35 = vunpack.c.l.b16 %v987_v37 }
 0x39d   :  { %v3689_v49 = vpop.f32.mrf.mxu2 }
 0x3a0   :  { %v3683_v21 = vpop.f32.mrf.mxu0 }
 0x3a1   :  { %v988_v63 = vpack.c.bf16 %v3683_v21, %v3683_v21  ;;  %v1279_v15 = vmul.f32 0.3, %v3683_v21 }
 0x3a3   :  { %v1020_v40 = vunpack.c.l.b16 %v988_v63 }
 0x3a5   :  { %v1028_v23 = vpack.c.b16 %v1020_v40, %v1019_v35  ;;  %v1234_v37 = vpop.f32.mrf.mxu2  ;;  %v1266_v35 = vmul.f32 0.3, %v3629_v33  ;;  %v4573_v33 = vld [vmem:[#allocation28_spill] sm:$0xff] }
 0x3a7   :  { %1209 = vmatmul.bf16.gmra.mxu1 %v1028_v23  ;;  %v1282_v40 = vadd.f32 %v1266_v35, %v4570_v36 }
 0x3a9   :  { %v1314_v10 = vmul.f32 0.4403842, %v1282_v40 }
 0x3b4   :  { %v1175_v26 = vpop.f32.mrf.mxu1 }
 0x3b5   :  { %v1225_v19 = vadd.f32 %v1224_v32, %v1175_v26  ;;  %v3700_v26 = vld [vmem:[#allocation2 + $0x8] sm:$0xff] }
 0x3b6   :  { %4571 = vst [vmem:[#allocation6_spill] sm:$0xff] %v3700_v26 }
 0x3b7   :  { %v1296_v47 = vmul.f32 0.5596158, %v1225_v19  ;;  %1683 = vmatmul.bf16.vlgmr.msra.gmra.mxu1 %v3691_v16  ;;  %v3703_v19 = vpop.f32.mrf.mxu2 }
 0x3b9   :  { %v3694_v17 = vadd.f32 %v1312_v50, %v1296_v47  ;;  %v1268_v50 = vmul.f32 0.3, %v3637_v61  ;;  %v4576_v61 = vld [vmem:[#allocation30_spill] sm:$0xff] }
 0x3bb   :  { %4569 = vst [vmem:[#allocation7_spill] sm:$0xff] %v3694_v17  ;;  %v1284_v43 = vadd.f32 %v1268_v50, %v4573_v33 }
 0x3bc   :  { %v3696_v63 = vpop.f32.mrf.mxu1 }
 0x3bf   :  { %v1239_v54 = vpop.f32.mrf.mxu2 }
 0x3c4   :  { %v1180_v23 = vpop.f32.mrf.mxu1 }
 0x3c5   :  { %v1230_v53 = vadd.f32 %v1229_v42, %v1180_v23  ;;  %v1316_v42 = vmul.f32 0.4403842, %v1284_v43  ;;  %v3711_v23 = vld [vmem:[#allocation2 + $0x10] sm:$0xff] }
 0x3c6   :  { %4574 = vst [vmem:[#allocation13_spill] sm:$0xff] %v3711_v23 }
 0x3c7   :  { %v1298_v41 = vmul.f32 0.5596158, %v1230_v53  ;;  %1688 = vmatmul.bf16.gmra.mxu1 %v3700_v26  ;;  %v3716_v26 = vpop.f32.mrf.mxu2 }
 0x3c9   :  { %v3705_v32 = vadd.f32 %v1314_v10, %v1298_v41  ;;  %v1270_v10 = vmul.f32 0.3, %v3645_v2 }
 0x3cb   :  { %4572 = vst [vmem:[#allocation25_spill] sm:$0xff] %v3705_v32  ;;  %v1286_v36 = vadd.f32 %v1270_v10, %v4576_v61 }
 0x3cc   :  { %v3707_v47 = vpop.f32.mrf.mxu1 }
 0x3cf   :  { %v1244_v33 = vpop.f32.mrf.mxu2 }
 0x3d4   :  { %v1185_v35 = vpop.f32.mrf.mxu1 }
 0x3d5   :  { %v1235_v38 = vadd.f32 %v1234_v37, %v1185_v35  ;;  %v1318_v37 = vmul.f32 0.4403842, %v1286_v36 }
 0x3d7   :  { %v1300_v40 = vmul.f32 0.5596158, %v1235_v38  ;;  %1693 = vmatmul.bf16.gmra.mxu1 %v3711_v23  ;;  %v3722_v38 = vld [vmem:[#allocation2 + $0x18] sm:$0xff]  ;;  %v1246_v23 = vpop.f32.mrf.mxu2 }
 0x3d8   :  { %4577 = vst [vmem:[#allocation19_spill] sm:$0xff] %v3722_v38 }
 0x3d9   :  { %v3714_v53 = vadd.f32 %v1316_v42, %v1300_v40  ;;  %v1272_v40 = vmul.f32 0.3, %v3653_v5 }
 0x3db   :  { %4575 = vst [vmem:[#allocation16_spill] sm:$0xff] %v3714_v53  ;;  %v1288_v2 = vadd.f32 %v1272_v40, %v4579_v60  ;;  %v4582_v40 = vld [vmem:[#allocation18_spill] sm:$0xff]  ;;  %v1276_v60 = vmul.f32 0.3, %v3669_v11  ;;  %v4583_v53 = vld [vmem:[#allocation21_spill] sm:$0xff] }
 0x3dc   :  { %v3718_v41 = vpop.f32.mrf.mxu1 }
 0x3dd   :  { %v1320_v61 = vmul.f32 0.4403842, %v1288_v2 }
 0x3e4   :  { %v1190_v16 = vpop.f32.mrf.mxu1 }
 0x3e5   :  { %v1240_v50 = vadd.f32 %v1239_v54, %v1190_v16  ;;  %v3731_v54 = vld [vmem:[#allocation2 + $0x20] sm:$0xff] }
 0x3e6   :  { %4580 = vst [vmem:[#allocation14_spill] sm:$0xff] %v3731_v54 }
 0x3e7   :  { %v1302_v43 = vmul.f32 0.5596158, %v1240_v50  ;;  %1698 = vmatmul.bf16.gmra.mxu1 %v3722_v38  ;;  %v1249_v50 = vpop.f32.mrf.mxu2 }
 0x3e9   :  { %v3725_v35 = vadd.f32 %v1318_v37, %v1302_v43 }
 0x3eb   :  { %4578 = vst [vmem:[#allocation22_spill] sm:$0xff] %v3725_v35 }
 0x3ec   :  { %v3727_v42 = vpop.f32.mrf.mxu1 }
 0x3ef   :  { %v1251_v43 = vpop.f32.mrf.mxu2 }
 0x3f4   :  { %v1195_v17 = vpop.f32.mrf.mxu1 }
 0x3f5   :  { %v1245_v10 = vadd.f32 %v1244_v33, %v1195_v17 }
 0x3f7   :  { %v1304_v16 = vmul.f32 0.5596158, %v1245_v10  ;;  %1703 = vmatmul.bf16.gmra.mxu1 %v3731_v54  ;;  %v1254_v59 = vpop.f32.mrf.mxu2  ;;  %v1278_v10 = vmul.f32 0.3, %v3677_v28  ;;  %v1277_v54 = vmul.f32 0.3, %v3673_v51 }
 0x3f8   :  { %v1274_v28 = vmul.f32 0.3, %v3661_v46  ;;  %v4584_v51 = vld [vmem:[#allocation34_spill] sm:$0xff] }
 0x3f9   :  { %v3734_v36 = vadd.f32 %v1320_v61, %v1304_v16  ;;  %v1293_v39 = vadd.f32 %v1277_v54, %v3459_v57  ;;  %v1292_v3 = vadd.f32 %v1276_v60, %v4584_v51 }
 0x3fa   :  { %v1290_v46 = vadd.f32 %v1274_v28, %v3475_v56 }
 0x3fc   :  { %v1197_v37 = vpop.f32.mrf.mxu1 }
 0x3fd   :  { %v1247_v51 = vadd.f32 %v1246_v23, %v1197_v37  ;;  %v4586_v37 = vmax.f32 %v3498_v24, 0.0 }
 0x3ff   :  { %v1256_v17 = vpop.f32.mrf.mxu2  ;;  %v1305_v23 = vmul.f32 0.5596158, %v1247_v51 }
 0x404   :  { %v1200_v38 = vpop.f32.mrf.mxu1 }
 0x407   :  { %1708 = vmatmul.bf16.gmra.mxu1 %v4581_v18  ;;  %v1259_v2 = vpop.f32.mrf.mxu2  ;;  %v1294_v18 = vadd.f32 %v1278_v10, %v3456_v14  ;;  %v1250_v10 = vadd.f32 %v1249_v50, %v1200_v38  ;;  %v4585_v38 = vmax.f32 %v3487_v62, 0.0 }
 0x409   :  { %v1326_v11 = vmul.f32 0.4403842, %v1294_v18 }
 0x40c   :  { %v1202_v5 = vpop.f32.mrf.mxu1 }
 0x40f   :  { %v1261_v12 = vpop.f32.mrf.mxu2 }
 0x414   :  { %v1205_v32 = vpop.f32.mrf.mxu1 }
 0x415   :  { %v1255_v8 = vadd.f32 %v1254_v59, %v1205_v32 }
 0x417   :  { %1713 = vmatmul.bf16.gmra.mxu1 %v4582_v40  ;;  %v1275_v40 = vmul.f32 0.3, %v3665_v30  ;;  %v1308_v54 = vmul.f32 0.5596158, %v1255_v8 }
 0x41c   :  { %v1207_v33 = vpop.f32.mrf.mxu1 }
 0x41d   :  { %v1257_v0 = vadd.f32 %v1256_v17, %v1207_v33  ;;  %v1273_v17 = vmul.f32 0.3, %v3657_v48  ;;  %v1325_v33 = vmul.f32 0.4403842, %v1293_v39 }
 0x41f   :  { %v1309_v21 = vmul.f32 0.5596158, %v1257_v0  ;;  %v1271_v0 = vmul.f32 0.3, %v3649_v27  ;;  %v1289_v48 = vadd.f32 %v1273_v17, %v3480_v29  ;;  %v4587_v27 = vmax.f32 %v3495_v45, 0.0 }
 0x420   :  { %v4588_v17 = vmax.f32 %v3505_v20, 0.0 }
 0x421   :  { %v1341_v18 = vadd.f32 %v1325_v33, %v1309_v21  ;;  %v1287_v62 = vadd.f32 %v1271_v0, %v3490_v52  ;;  %v4589_v33 = vmax.f32 %v3518_v13, 0.0 }
 0x423   :  { %v3762_v28 = vadd.f32 %v1341_v18, %v4586_v37  ;;  %v1265_v18 = vmul.f32 0.3, %v3625_v31 }
 0x424   :  { %v1210_v61 = vpop.f32.mrf.mxu1 }
 0x425   :  { %v1260_v16 = vadd.f32 %v1259_v2, %v1210_v61  ;;  %v1295_v2 = vadd.f32 %v1279_v15, %v3467_v6  ;;  %v1252_v61 = vadd.f32 %v1251_v43, %v1202_v5 }
 0x427   :  { %1718 = vmatmul.bf16.gmra.mxu1 %v4583_v53  ;;  %v1310_v35 = vmul.f32 0.5596158, %v1260_v16  ;;  %v1291_v53 = vadd.f32 %v1275_v40, %v3469_v7  ;;  %v1324_v16 = vmul.f32 0.4403842, %v1292_v3  ;;  %v1327_v60 = vmul.f32 0.4403842, %v1295_v2 }
 0x428   :  { %v1307_v15 = vmul.f32 0.5596158, %v1252_v61  ;;  %v1306_v40 = vmul.f32 0.5596158, %v1250_v10  ;;  %v1242_v3 = vadd.f32 %v3716_v26, %v3727_v42  ;;  %v1321_v61 = vmul.f32 0.4403842, %v1289_v48 }
 0x429   :  { %v1342_v59 = vadd.f32 %v1326_v11, %v1310_v35  ;;  %v1323_v5 = vmul.f32 0.4403842, %v1291_v53  ;;  %v1340_v39 = vadd.f32 %v1324_v16, %v1308_v54  ;;  %v1322_v35 = vmul.f32 0.4403842, %v1290_v46 }
 0x42a   :  { %v1269_v11 = vmul.f32 0.3, %v3641_v58  ;;  %v1237_v42 = vadd.f32 %v3703_v19, %v3718_v41  ;;  %v1303_v45 = vmul.f32 0.5596158, %v1242_v3  ;;  %v1337_v51 = vadd.f32 %v1321_v61, %v1305_v23  ;;  %v4595_v3 = vld [vmem:[#allocation12_spill] sm:$0xff] }
 0x42b   :  { %v3756_v8 = vadd.f32 %v1342_v59, %v4585_v38  ;;  %v1339_v50 = vadd.f32 %v1323_v5, %v1307_v15  ;;  %v1338_v21 = vadd.f32 %v1322_v35, %v1306_v40  ;;  %v3772_v53 = vadd.f32 %v1340_v39, %v4588_v17 }
 0x42c   :  { %v1212_v30 = vpop.f32.mrf.mxu1  ;;  %v1267_v10 = vmul.f32 0.3, %v3633_v4  ;;  %v1285_v54 = vadd.f32 %v1269_v11, %v3508_v1  ;;  %v1319_v59 = vmul.f32 0.4403842, %v1287_v62  ;;  %v4590_v19 = vmax.f32 %v3524_v55, 0.0 }
 0x42d   :  { %v1262_v32 = vadd.f32 %v1261_v12, %v1212_v30  ;;  %v4480_v26 = vmax.f32 %v3756_v8, 0.0  ;;  %v3780_v58 = vadd.f32 %v1339_v50, %v4589_v33  ;;  %v4479_v30 = vmax.f32 %v3762_v28, 0.0  ;;  %v4597_v50 = vld [vmem:[#allocation22_spill] sm:$0xff] }
 0x42e   :  { %v3791_v41 = vadd.f32 %v1338_v21, %v4590_v19  ;;  %v4477_v13 = vmax.f32 %v3772_v53, 0.0  ;;  %v1301_v46 = vmul.f32 0.5596158, %v1237_v42  ;;  %v1335_v16 = vadd.f32 %v1319_v59, %v1303_v45  ;;  %v4602_v42 = vld [vmem:[#allocation11_spill] sm:$0xff] }
 0x42f   :  { %v1311_v43 = vmul.f32 0.5596158, %v1262_v32  ;;  %v1232_v32 = vadd.f32 %v3689_v49, %v3707_v47  ;;  %v4476_v55 = vmax.f32 %v3780_v58, 0.0  ;;  %v1317_v0 = vmul.f32 0.4403842, %v1285_v54  ;;  %v4606_v54 = vld [vmem:[#allocation10_spill] sm:$0xff] }
 0x430   :  { %v1382_v4 = vpack.c.bf16 %v4479_v30, %v4477_v13  ;;  %v4592_v49 = vmax.f32 %v3544_v44, 0.0  ;;  %v1227_v48 = vadd.f32 %v3681_v34, %v3696_v63  ;;  %v4593_v39 = vmax.f32 %v3556_v25, 0.0 }
 0x431   :  { %v1343_v12 = vadd.f32 %v1327_v60, %v1311_v43  ;;  %v4591_v60 = vmax.f32 %v3537_v9, 0.0  ;;  %v1283_v43 = vadd.f32 %v1267_v10, %v3527_v22  ;;  %v4475_v9 = vmax.f32 %v3791_v41, 0.0 }
 0x432   :  { %v3810_v47 = vadd.f32 %v3734_v36, %v4592_v49  ;;  %v1299_v5 = vmul.f32 0.5596158, %v1232_v32  ;;  %v1333_v40 = vadd.f32 %v1317_v0, %v1301_v46  ;;  %v3817_v38 = vadd.f32 %v1335_v16, %v4593_v39  ;;  %v4594_v36 = vld [vmem:[#allocation35_spill] sm:$0xff]  ;;  %v4609_v16 = vld [vmem:[#allocation29_spill] sm:$0xff]  ;;  %v4616_v39 = vld [vmem:[#allocation8_spill] sm:$0xff] }
 0x433   :  { %v3766_v2 = vadd.f32 %v1343_v12, %v4587_v27  ;;  %v3798_v15 = vadd.f32 %v1337_v51, %v4591_v60  ;;  %v1381_v44 = vpack.c.bf16 %v4476_v55, %v4475_v9  ;;  %v1281_v12 = vadd.f32 %v1265_v18, %v4594_v36  ;;  %v4599_v27 = vld [vmem:[#allocation31_spill] sm:$0xff]  ;;  %v4604_v51 = vld [vmem:[#allocation16_spill] sm:$0xff]  ;;  %v4613_v0 = vld [vmem:[#allocation9_spill] sm:$0xff] }
 0x434   :  { %v1315_v35 = vmul.f32 0.4403842, %v1283_v43  ;;  %v4596_v23 = vmax.f32 %v4595_v3, 0.0  ;;  %v4473_v63 = vmax.f32 %v3810_v47, 0.0  ;;  %v1297_v25 = vmul.f32 0.5596158, %v1227_v48 }
 0x435   :  { %v4478_v24 = vmax.f32 %v3766_v2, 0.0  ;;  %v4474_v31 = vmax.f32 %v3798_v15, 0.0  ;;  %v4600_v11 = vmax.f32 %v4599_v27, 0.0  ;;  %v4472_v21 = vmax.f32 %v3817_v38, 0.0  ;;  %v3889_v27 = vld [vmem:[%s4398_s1] sm:$0xff] }
 0x436   :  { %v3828_v34 = vadd.f32 %v4597_v50, %v4596_v23  ;;  %v1331_v37 = vadd.f32 %v1315_v35, %v1299_v5  ;;  %v1313_v17 = vmul.f32 0.4403842, %v1281_v12  ;;  %v4603_v45 = vmax.f32 %v4602_v42, 0.0  ;;  %v4618_v12 = vld [vmem:[#allocation7_spill] sm:$0xff]  ;;  %4620 = vst [vmem:[#allocation22_spill] sm:$0xff] %v3889_v27  ;;  %v3913_v42 = vld [vmem:[%s4398_s1 + $0x20] sm:$0xff] }
 0x437   :  { %v1383_v20 = vpack.c.bf16 %v4478_v24, %v4480_v26  ;;  %v3833_v62 = vadd.f32 %v1333_v40, %v4600_v11  ;;  %v1380_v61 = vpack.c.bf16 %v4474_v31, %v4473_v63  ;;  %v4607_v59 = vmax.f32 %v4606_v54, 0.0  ;;  %v3895_v11 = vld [vmem:[%s4398_s1 + $0x8] sm:$0xff]  ;;  %4624 = vst [vmem:[#allocation10_spill] sm:$0xff] %v3913_v42 }
 0x438   :  { %4598 = vst [vmem:[#allocation17_spill] sm:$0xff] %v3828_v34  ;;  %v3843_v33 = vadd.f32 %v4604_v51, %v4603_v45  ;;  %v1329_v10 = vadd.f32 %v1313_v17, %v1297_v25  ;;  %v4610_v60 = vmax.f32 %v4609_v16, 0.0  ;;  %v4614_v49 = vmax.f32 %v4613_v0, 0.0  ;;  %v3907_v17 = vld [vmem:[%s4398_s1 + $0x18] sm:$0xff]  ;;  %v3919_v45 = vld [vmem:[%s4398_s1 + $0x28] sm:$0xff]  ;;  %v2910_v0 = vld [vmem:[#allocation3 + $0x100] sm:$0xff] }
 0x439   :  { %1384 = vmatpush.bf16.msra.mxu3 %v1383_v20  ;;  %4601 = vst [vmem:[#allocation20_spill] sm:$0xff] %v3833_v62  ;;  %v4471_v20 = vmax.f32 %v3828_v34, 0.0  ;;  %v3848_v19 = vadd.f32 %v1331_v37, %v4607_v59  ;;  %v4470_v46 = vmax.f32 %v3833_v62, 0.0  ;;  %v2917_v51 = vld [vmem:[#allocation3 + $0x138] sm:$0xff]  ;;  %v2915_v54 = vld [vmem:[#allocation3 + $0x128] sm:$0xff]  ;;  %v2914_v59 = vld [vmem:[#allocation3 + $0x120] sm:$0xff] }
 0x43a   :  { %4605 = vst [vmem:[#allocation23_spill] sm:$0xff] %v3843_v33  ;;  %v4469_v43 = vmax.f32 %v3843_v33, 0.0  ;;  %v3863_v48 = vadd.f32 %v1329_v10, %v4614_v49  ;;  %1626 = vmatpush.bf16.msra.mxu0 %v2917_v51  ;;  %v2916_v10 = vld [vmem:[#allocation3 + $0x130] sm:$0xff]  ;;  %v2913_v16 = vld [vmem:[#allocation3 + $0x118] sm:$0xff]  ;;  %v2935_v63 = vld [vmem:[#allocation3 + $0x1c8] sm:$0xff] }
 0x43b   :  { %4608 = vst [vmem:[#allocation15_spill] sm:$0xff] %v3848_v19  ;;  %v1379_v32 = vpack.c.bf16 %v4472_v21, %v4471_v20  ;;  %v4468_v40 = vmax.f32 %v3848_v19, 0.0  ;;  %v3931_v49 = vld [vmem:[%s4398_s1 + $0x38] sm:$0xff] }
 0x43c   :  { %4615 = vst [vmem:[#allocation21_spill] sm:$0xff] %v3863_v48  ;;  %v1378_v5 = vpack.c.bf16 %v4470_v46, %v4469_v43  ;;  %v4466_v50 = vmax.f32 %v3863_v48, 0.0  ;;  %v2941_v20 = vld [vmem:[#allocation3 + $0x1f8] sm:$0xff] }
 0x43d   :  { %1385 = vmatpush.bf16.msra.mxu3 %v1382_v4  ;;  %v4611_v4 = vld [vmem:[#allocation25_spill] sm:$0xff]  ;;  %4621 = vst [vmem:[#allocation31_spill] sm:$0xff] %v3895_v11 }
 0x43e   :  { %v3858_v18 = vadd.f32 %v4611_v4, %v4610_v60  ;;  %4623 = vst [vmem:[#allocation16_spill] sm:$0xff] %v3907_v17  ;;  %1627 = vmatpush.bf16.msra.mxu0 %v2916_v10  ;;  %v2912_v60 = vld [vmem:[#allocation3 + $0x110] sm:$0xff]  ;;  %v2911_v4 = vld [vmem:[#allocation3 + $0x108] sm:$0xff] }
 0x43f   :  { %4625 = vst [vmem:[#allocation29_spill] sm:$0xff] %v3919_v45 }
 0x440   :  { %4612 = vst [vmem:[#allocation18_spill] sm:$0xff] %v3858_v18  ;;  %v4467_v3 = vmax.f32 %v3858_v18, 0.0  ;;  %v3028_v18 = vld [vmem:[#allocation2 + $0x30] sm:$0xff] }
 0x441   :  { %1386 = vmatpush.bf16.msra.mxu3 %v1381_v44  ;;  %v4617_v44 = vmax.f32 %v4616_v39, 0.0  ;;  %4627 = vst [vmem:[#allocation9_spill] sm:$0xff] %v3931_v49 }
 0x442   :  { %v1377_v23 = vpack.c.bf16 %v4468_v40, %v4467_v3  ;;  %1628 = vmatpush.bf16.msra.mxu0 %v2915_v54 }
 0x443   :  { %v3873_v35 = vadd.f32 %v4618_v12, %v4617_v44 }
 0x445   :  { %1387 = vmatpush.bf16.msra.mxu3 %v1380_v61  ;;  %4619 = vst [vmem:[#allocation12_spill] sm:$0xff] %v3873_v35  ;;  %v4465_v25 = vmax.f32 %v3873_v35, 0.0  ;;  %v3901_v61 = vld [vmem:[%s4398_s1 + $0x10] sm:$0xff] }
 0x446   :  { %4622 = vst [vmem:[#allocation11_spill] sm:$0xff] %v3901_v61  ;;  %1629 = vmatpush.bf16.msra.mxu0 %v2914_v59 }
 0x447   :  { %v1376_v37 = vpack.c.bf16 %v4466_v50, %v4465_v25 }
 0x449   :  { %1388 = vmatpush.bf16.msra.mxu3 %v1379_v32  ;;  %v3925_v32 = vld [vmem:[%s4398_s1 + $0x30] sm:$0xff] }
 0x44a   :  { %4626 = vst [vmem:[#allocation25_spill] sm:$0xff] %v3925_v32  ;;  %1630 = vmatpush.bf16.msra.mxu0 %v2913_v16 }
 0x44d   :  { %1389 = vmatpush.bf16.msra.mxu3 %v1378_v5 }
 0x44e   :  { %1631 = vmatpush.bf16.msra.mxu0 %v2912_v60 }
 0x451   :  { %1390 = vmatpush.bf16.msra.mxu3 %v1377_v23 }
 0x452   :  { %1632 = vmatpush.bf16.msra.mxu0 %v2911_v4 }
 0x455   :  { %1391 = vmatpush.bf16.msra.mxu3 %v1376_v37 }
 0x456   :  { %1633 = vmatpush.bf16.msra.mxu0 %v2910_v0 }
 0x458   :  { %1392 = vmatmul.bf16.vlgmr.msra.gmra.mxu3 %v3889_v27 }
 0x45a   :  { %2135 = vmatpush.bf16.msrb.mxu0 %v2941_v20 }
 0x468   :  { %1397 = vmatmul.bf16.gmra.mxu3 %v3895_v11 }
 0x478   :  { %1402 = vmatmul.bf16.gmra.mxu3 %v3901_v61  ;;  %v4632_v61 = vld [vmem:[#allocation6_spill] sm:$0xff] }
 0x488   :  { %1407 = vmatmul.bf16.gmra.mxu3 %v3907_v17 }
 0x498   :  { %1412 = vmatmul.bf16.gmra.mxu3 %v3913_v42 }
 0x4a8   :  { %1417 = vmatmul.bf16.gmra.mxu3 %v3919_v45  ;;  %v4629_v45 = vld [vmem:[#allocation27_spill] sm:$0xff] }
 0x4b8   :  { %1422 = vmatmul.bf16.gmra.mxu3 %v3925_v32 }
 0x4c8   :  { %1427 = vmatmul.bf16.gmra.mxu3 %v3931_v49 }
 0x4db   :  { %v3934_v5 = vpop.f32.mrf.mxu3 }
 0x4dc   :  { %v1433_v39 = vpack.c.bf16 %v3934_v5, %v3934_v5 }
 0x4de   :  { %v1465_v23 = vunpack.c.l.b16 %v1433_v39 }
 0x4e3   :  { %v3938_v44 = vpop.f32.mrf.mxu3 }
 0x4e4   :  { %v1434_v12 = vpack.c.bf16 %v3938_v44, %v3938_v44 }
 0x4e6   :  { %v1466_v37 = vunpack.c.l.b16 %v1434_v12 }
 0x4e8   :  { %v1481_v51 = vpack.c.b16 %v1466_v37, %v1465_v23 }
 0x4ea   :  { %1634 = vmatmul.bf16.vlgmr.msra.gmra.mxu0 %v1481_v51 }
 0x4eb   :  { %v3942_v10 = vpop.f32.mrf.mxu3 }
 0x4ec   :  { %v1435_v54 = vpack.c.bf16 %v3942_v10, %v3942_v10 }
 0x4ee   :  { %v1467_v60 = vunpack.c.l.b16 %v1435_v54 }
 0x4f3   :  { %v3946_v59 = vpop.f32.mrf.mxu3 }
 0x4f4   :  { %v1436_v16 = vpack.c.bf16 %v3946_v59, %v3946_v59 }
 0x4f6   :  { %v1468_v4 = vunpack.c.l.b16 %v1436_v16 }
 0x4f8   :  { %v1482_v0 = vpack.c.b16 %v1468_v4, %v1467_v60 }
 0x4fa   :  { %1639 = vmatmul.bf16.gmra.mxu0 %v1482_v0 }
 0x4fb   :  { %v3950_v25 = vpop.f32.mrf.mxu3 }
 0x4fc   :  { %v1437_v39 = vpack.c.bf16 %v3950_v25, %v3950_v25 }
 0x4fe   :  { %v1469_v37 = vunpack.c.l.b16 %v1437_v39 }
 0x503   :  { %v3954_v12 = vpop.f32.mrf.mxu3 }
 0x504   :  { %v1438_v23 = vpack.c.bf16 %v3954_v12, %v3954_v12 }
 0x506   :  { %v1470_v51 = vunpack.c.l.b16 %v1438_v23 }
 0x508   :  { %v1483_v50 = vpack.c.b16 %v1470_v51, %v1469_v37 }
 0x50a   :  { %1644 = vmatmul.bf16.gmra.mxu0 %v1483_v50 }
 0x50b   :  { %v3958_v3 = vpop.f32.mrf.mxu3 }
 0x50c   :  { %v1439_v54 = vpack.c.bf16 %v3958_v3, %v3958_v3 }
 0x50e   :  { %v1471_v4 = vunpack.c.l.b16 %v1439_v54  ;;  %v2940_v54 = vld [vmem:[#allocation3 + $0x1f0] sm:$0xff] }
 0x50f   :  { %2136 = vmatpush.bf16.msrb.mxu0 %v2940_v54  ;;  %v2936_v54 = vld [vmem:[#allocation3 + $0x1d0] sm:$0xff] }
 0x513   :  { %v3962_v16 = vpop.f32.mrf.mxu3 }
 0x514   :  { %v1440_v60 = vpack.c.bf16 %v3962_v16, %v3962_v16 }
 0x516   :  { %v1472_v0 = vunpack.c.l.b16 %v1440_v60  ;;  %v2939_v60 = vld [vmem:[#allocation3 + $0x1e8] sm:$0xff] }
 0x517   :  { %2137 = vmatpush.bf16.msrb.mxu0 %v2939_v60 }
 0x518   :  { %v1484_v40 = vpack.c.b16 %v1472_v0, %v1471_v4 }
 0x51a   :  { %1649 = vmatmul.bf16.gmra.mxu0 %v1484_v40 }
 0x51b   :  { %v3966_v43 = vpop.f32.mrf.mxu3 }
 0x51c   :  { %v1441_v39 = vpack.c.bf16 %v3966_v43, %v3966_v43 }
 0x51e   :  { %v1473_v37 = vunpack.c.l.b16 %v1441_v39 }
 0x523   :  { %v3970_v50 = vpop.f32.mrf.mxu3 }
 0x524   :  { %v1442_v23 = vpack.c.bf16 %v3970_v50, %v3970_v50 }
 0x526   :  { %v1474_v51 = vunpack.c.l.b16 %v1442_v23 }
 0x528   :  { %v1485_v46 = vpack.c.b16 %v1474_v51, %v1473_v37  ;;  %v2938_v37 = vld [vmem:[#allocation3 + $0x1e0] sm:$0xff]  ;;  %v2937_v51 = vld [vmem:[#allocation3 + $0x1d8] sm:$0xff] }
 0x529   :  { %2138 = vmatpush.bf16.msrb.mxu0 %v2938_v37  ;;  %v1684_v37 = vpop.f32.mrf.mxu1 }
 0x52a   :  { %1654 = vmatmul.bf16.gmra.mxu0 %v1485_v46 }
 0x52b   :  { %v3974_v21 = vpop.f32.mrf.mxu3 }
 0x52c   :  { %v1443_v40 = vpack.c.bf16 %v3974_v21, %v3974_v21 }
 0x52d   :  { %2139 = vmatpush.bf16.msrb.mxu0 %v2937_v51 }
 0x52e   :  { %v1475_v39 = vunpack.c.l.b16 %v1443_v40 }
 0x531   :  { %2140 = vmatpush.bf16.msrb.mxu0 %v2936_v54  ;;  %v3994_v54 = vpop.f32.mrf.mxu1 }
 0x533   :  { %v3978_v4 = vpop.f32.mrf.mxu3 }
 0x534   :  { %v1444_v0 = vpack.c.bf16 %v3978_v4, %v3978_v4 }
 0x535   :  { %2141 = vmatpush.bf16.msrb.mxu0 %v2935_v63 }
 0x536   :  { %v1476_v23 = vunpack.c.l.b16 %v1444_v0 }
 0x538   :  { %v1486_v46 = vpack.c.b16 %v1476_v23, %v1475_v39  ;;  %v2934_v39 = vld [vmem:[#allocation3 + $0x1c0] sm:$0xff] }
 0x539   :  { %2142 = vmatpush.bf16.msrb.mxu0 %v2934_v39  ;;  %v4628_v39 = vld [vmem:[#allocation24_spill] sm:$0xff] }
 0x53a   :  { %1659 = vmatmul.bf16.gmra.mxu0 %v1486_v46 }
 0x53b   :  { %v3982_v20 = vpop.f32.mrf.mxu3 }
 0x53c   :  { %v1445_v31 = vpack.c.bf16 %v3982_v20, %v3982_v20 }
 0x53e   :  { %v1477_v60 = vunpack.c.l.b16 %v1445_v31 }
 0x543   :  { %v3986_v9 = vpop.f32.mrf.mxu3 }
 0x544   :  { %v1446_v40 = vpack.c.bf16 %v3986_v9, %v3986_v9 }
 0x546   :  { %v1478_v0 = vunpack.c.l.b16 %v1446_v40 }
 0x548   :  { %v1487_v23 = vpack.c.b16 %v1478_v0, %v1477_v60  ;;  %v1689_v60 = vpop.f32.mrf.mxu1  ;;  %v1724_v0 = vmul.f32 0.3, %v3934_v5 }
 0x54a   :  { %1664 = vmatmul.bf16.gmra.mxu0 %v1487_v23  ;;  %v1740_v23 = vadd.f32 %v1724_v0, %v4628_v39 }
 0x54b   :  { %v3990_v46 = vpop.f32.mrf.mxu3 }
 0x54c   :  { %v1447_v51 = vpack.c.bf16 %v3990_v46, %v3990_v46  ;;  %v1772_v49 = vmul.f32 0.5945349, %v1740_v23 }
 0x54e   :  { %v1479_v63 = vunpack.c.l.b16 %v1447_v51  ;;  %v1726_v51 = vmul.f32 0.3, %v3942_v10 }
 0x550   :  { %v4002_v24 = vpop.f32.mrf.mxu1 }
 0x553   :  { %v3996_v55 = vpop.f32.mrf.mxu3 }
 0x554   :  { %v1448_v13 = vpack.c.bf16 %v3996_v55, %v3996_v55 }
 0x556   :  { %v1480_v31 = vunpack.c.l.b16 %v1448_v13 }
 0x558   :  { %v1488_v40 = vpack.c.b16 %v1480_v31, %v1479_v63  ;;  %v1694_v13 = vpop.f32.mrf.mxu1  ;;  %v4631_v63 = vld [vmem:[#allocation26_spill] sm:$0xff] }
 0x559   :  { %v1742_v31 = vadd.f32 %v1726_v51, %v4631_v63 }
 0x55a   :  { %1669 = vmatmul.bf16.gmra.mxu0 %v1488_v40 }
 0x55b   :  { %v1774_v0 = vmul.f32 0.5945349, %v1742_v31 }
 0x567   :  { %v1635_v30 = vpop.f32.mrf.mxu0 }
 0x568   :  { %v1685_v26 = vadd.f32 %v1684_v37, %v1635_v30  ;;  %v4012_v30 = vpop.f32.mrf.mxu1  ;;  %v4634_v37 = vld [vmem:[#allocation28_spill] sm:$0xff] }
 0x56a   :  { %v1756_v32 = vmul.f32 0.4054651, %v1685_v26  ;;  %2143 = vmatmul.bf16.vlgmr.msrb.gmra.mxu0 %v4629_v45 }
 0x56c   :  { %v4005_v42 = vadd.f32 %v1772_v49, %v1756_v32  ;;  %v1728_v32 = vmul.f32 0.3, %v3950_v25 }
 0x56e   :  { %4630 = vst [vmem:[#allocation8_spill] sm:$0xff] %v4005_v42  ;;  %v1744_v23 = vadd.f32 %v1728_v32, %v4634_v37 }
 0x56f   :  { %v4007_v17 = vpop.f32.mrf.mxu0 }
 0x570   :  { %v1699_v49 = vpop.f32.mrf.mxu1  ;;  %v1776_v51 = vmul.f32 0.5945349, %v1744_v23 }
 0x577   :  { %v1640_v5 = vpop.f32.mrf.mxu0 }
 0x578   :  { %v1690_v40 = vadd.f32 %v1689_v60, %v1640_v5  ;;  %v4635_v60 = vld [vmem:[#allocation13_spill] sm:$0xff] }
 0x57a   :  { %v1758_v39 = vmul.f32 0.4054651, %v1690_v40  ;;  %2148 = vmatmul.bf16.gmra.mxu0 %v4632_v61  ;;  %v4023_v61 = vpop.f32.mrf.mxu1  ;;  %v4637_v40 = vld [vmem:[#allocation30_spill] sm:$0xff] }
 0x57c   :  { %v4014_v26 = vadd.f32 %v1774_v0, %v1758_v39  ;;  %v1730_v39 = vmul.f32 0.3, %v3958_v3 }
 0x57e   :  { %4633 = vst [vmem:[#allocation7_spill] sm:$0xff] %v4014_v26  ;;  %v1746_v0 = vadd.f32 %v1730_v39, %v4637_v40  ;;  %v4641_v40 = vld [vmem:[#allocation14_spill] sm:$0xff] }
 0x57f   :  { %v4016_v45 = vpop.f32.mrf.mxu0 }
 0x580   :  { %v1778_v32 = vmul.f32 0.5945349, %v1746_v0 }
 0x582   :  { %v1704_v42 = vpop.f32.mrf.mxu1 }
 0x587   :  { %v1645_v10 = vpop.f32.mrf.mxu0 }
 0x588   :  { %v1695_v11 = vadd.f32 %v1694_v13, %v1645_v10  ;;  %v4638_v13 = vld [vmem:[#allocation19_spill] sm:$0xff] }
 0x58a   :  { %v1760_v63 = vmul.f32 0.4054651, %v1695_v11  ;;  %2153 = vmatmul.bf16.gmra.mxu0 %v4635_v60  ;;  %v1706_v10 = vpop.f32.mrf.mxu1 }
 0x58c   :  { %v4021_v31 = vadd.f32 %v1776_v51, %v1760_v63  ;;  %v1732_v63 = vmul.f32 0.3, %v3966_v43  ;;  %v4640_v51 = vld [vmem:[#allocation32_spill] sm:$0xff] }
 0x58e   :  { %4636 = vst [vmem:[#allocation27_spill] sm:$0xff] %v4021_v31  ;;  %v1748_v60 = vadd.f32 %v1732_v63, %v4640_v51  ;;  %v3029_v31 = vld [vmem:[#allocation2 + $0x38] sm:$0xff] }
 0x58f   :  { %v4025_v5 = vpop.f32.mrf.mxu0 }
 0x590   :  { %v1780_v48 = vmul.f32 0.5945349, %v1748_v60 }
 0x597   :  { %v1650_v25 = vpop.f32.mrf.mxu0 }
 0x598   :  { %v1700_v27 = vadd.f32 %v1699_v49, %v1650_v25 }
 0x59a   :  { %v1762_v37 = vmul.f32 0.4054651, %v1700_v27  ;;  %2158 = vmatmul.bf16.gmra.mxu0 %v4638_v13  ;;  %v1709_v27 = vpop.f32.mrf.mxu1 }
 0x59c   :  { %v4030_v11 = vadd.f32 %v1778_v32, %v1762_v37  ;;  %v3027_v32 = vld [vmem:[#allocation2 + $0x28] sm:$0xff] }
 0x59e   :  { %4639 = vst [vmem:[#allocation6_spill] sm:$0xff] %v4030_v11 }
 0x59f   :  { %v4032_v23 = vpop.f32.mrf.mxu0 }
 0x5a2   :  { %v1711_v25 = vpop.f32.mrf.mxu1 }
 0x5a7   :  { %v1655_v35 = vpop.f32.mrf.mxu0 }
 0x5a8   :  { %v1705_v3 = vadd.f32 %v1704_v42, %v1655_v35  ;;  %v1738_v42 = vmul.f32 0.3, %v3990_v46  ;;  %v1734_v46 = vmul.f32 0.3, %v3974_v21 }
 0x5aa   :  { %v1764_v39 = vmul.f32 0.4054651, %v1705_v3  ;;  %2163 = vmatmul.bf16.gmra.mxu0 %v4641_v40  ;;  %v1714_v26 = vpop.f32.mrf.mxu1  ;;  %v1737_v40 = vmul.f32 0.3, %v3986_v9  ;;  %v1736_v3 = vmul.f32 0.3, %v3982_v20  ;;  %v1750_v21 = vadd.f32 %v1734_v46, %v3475_v56 }
 0x5ab   :  { %v4642_v9 = vld [vmem:[#allocation34_spill] sm:$0xff] }
 0x5ac   :  { %v4037_v49 = vadd.f32 %v1780_v48, %v1764_v39  ;;  %v1739_v39 = vmul.f32 0.3, %v3996_v55  ;;  %v1753_v33 = vadd.f32 %v1737_v40, %v3459_v57  ;;  %v1752_v34 = vadd.f32 %v1736_v3, %v4642_v9 }
 0x5af   :  { %v1657_v0 = vpop.f32.mrf.mxu0 }
 0x5b2   :  { %v1716_v63 = vpop.f32.mrf.mxu1 }
 0x5b7   :  { %v1660_v37 = vpop.f32.mrf.mxu0 }
 0x5ba   :  { %2168 = vmatmul.bf16.gmra.mxu0 %v3027_v32  ;;  %v1719_v35 = vpop.f32.mrf.mxu1  ;;  %v1754_v32 = vadd.f32 %v1738_v42, %v3456_v14  ;;  %v1710_v42 = vadd.f32 %v1709_v27, %v1660_v37  ;;  %v1707_v14 = vadd.f32 %v1706_v10, %v1657_v0  ;;  %v4643_v27 = vmax.f32 %v3756_v8, 0.0 }
 0x5bb   :  { %v4644_v37 = vmax.f32 %v3762_v28, 0.0 }
 0x5bc   :  { %v1786_v20 = vmul.f32 0.5945349, %v1754_v32  ;;  %v1765_v10 = vmul.f32 0.4054651, %v1707_v14 }
 0x5bf   :  { %v1662_v13 = vpop.f32.mrf.mxu0 }
 0x5c2   :  { %v1721_v36 = vpop.f32.mrf.mxu1 }
 0x5c7   :  { %v1665_v43 = vpop.f32.mrf.mxu0 }
 0x5c8   :  { %v1715_v62 = vadd.f32 %v1714_v26, %v1665_v43 }
 0x5ca   :  { %2173 = vmatmul.bf16.gmra.mxu0 %v3028_v18  ;;  %v1735_v18 = vmul.f32 0.3, %v3978_v4  ;;  %v1768_v40 = vmul.f32 0.4054651, %v1715_v62 }
 0x5cf   :  { %v1667_v51 = vpop.f32.mrf.mxu0 }
 0x5d0   :  { %v1717_v19 = vadd.f32 %v1716_v63, %v1667_v51  ;;  %v1733_v51 = vmul.f32 0.3, %v3970_v50  ;;  %v1785_v63 = vmul.f32 0.5945349, %v1753_v33 }
 0x5d2   :  { %v1769_v55 = vmul.f32 0.4054651, %v1717_v19  ;;  %v1731_v19 = vmul.f32 0.3, %v3962_v16  ;;  %v1749_v50 = vadd.f32 %v1733_v51, %v3480_v29  ;;  %v4645_v16 = vmax.f32 %v3766_v2, 0.0 }
 0x5d3   :  { %v4646_v51 = vmax.f32 %v3772_v53, 0.0 }
 0x5d4   :  { %v1801_v32 = vadd.f32 %v1785_v63, %v1769_v55  ;;  %v1747_v8 = vadd.f32 %v1731_v19, %v3490_v52  ;;  %v4647_v63 = vmax.f32 %v3780_v58, 0.0 }
 0x5d6   :  { %v4062_v46 = vadd.f32 %v1801_v32, %v4644_v37  ;;  %v1725_v32 = vmul.f32 0.3, %v3938_v44 }
 0x5d7   :  { %v1670_v48 = vpop.f32.mrf.mxu0 }
 0x5d8   :  { %v1720_v60 = vadd.f32 %v1719_v35, %v1670_v48  ;;  %v1755_v35 = vadd.f32 %v1739_v39, %v3467_v6  ;;  %v1712_v48 = vadd.f32 %v1711_v25, %v1662_v13 }
 0x5da   :  { %2178 = vmatmul.bf16.gmra.mxu0 %v3029_v31  ;;  %v1770_v11 = vmul.f32 0.4054651, %v1720_v60  ;;  %v1751_v31 = vadd.f32 %v1735_v18, %v3469_v7  ;;  %v1784_v60 = vmul.f32 0.5945349, %v1752_v34  ;;  %v1787_v3 = vmul.f32 0.5945349, %v1755_v35 }
 0x5db   :  { %v1767_v39 = vmul.f32 0.4054651, %v1712_v48  ;;  %v1766_v18 = vmul.f32 0.4054651, %v1710_v42  ;;  %v1702_v34 = vadd.f32 %v4023_v61, %v4032_v23  ;;  %v1781_v48 = vmul.f32 0.5945349, %v1749_v50 }
 0x5dc   :  { %v1802_v26 = vadd.f32 %v1786_v20, %v1770_v11  ;;  %v1783_v13 = vmul.f32 0.5945349, %v1751_v31  ;;  %v1800_v33 = vadd.f32 %v1784_v60, %v1768_v40  ;;  %v1782_v11 = vmul.f32 0.5945349, %v1750_v21 }
 0x5dd   :  { %v1729_v20 = vmul.f32 0.3, %v3954_v12  ;;  %v1697_v61 = vadd.f32 %v4012_v30, %v4025_v5  ;;  %v1763_v2 = vmul.f32 0.4054651, %v1702_v34  ;;  %v1797_v23 = vadd.f32 %v1781_v48, %v1765_v10  ;;  %v4653_v34 = vld [vmem:[#allocation17_spill] sm:$0xff] }
 0x5de   :  { %v4056_v62 = vadd.f32 %v1802_v26, %v4643_v27  ;;  %v1799_v0 = vadd.f32 %v1783_v13, %v1767_v39  ;;  %v1798_v55 = vadd.f32 %v1782_v11, %v1766_v18  ;;  %v4072_v31 = vadd.f32 %v1800_v33, %v4646_v51 }
 0x5df   :  { %v1672_v4 = vpop.f32.mrf.mxu0  ;;  %v1727_v42 = vmul.f32 0.3, %v3946_v59  ;;  %v1745_v40 = vadd.f32 %v1729_v20, %v3508_v1  ;;  %v1779_v26 = vmul.f32 0.5945349, %v1747_v8  ;;  %v4648_v30 = vmax.f32 %v3791_v41, 0.0 }
 0x5e0   :  { %v1722_v43 = vadd.f32 %v1721_v36, %v1672_v4  ;;  %v4498_v14 = vmax.f32 %v4056_v62, 0.0  ;;  %v4080_v12 = vadd.f32 %v1799_v0, %v4647_v63  ;;  %v4499_v4 = vmax.f32 %v4062_v46, 0.0  ;;  %v4655_v0 = vld [vmem:[#allocation6_spill] sm:$0xff] }
 0x5e1   :  { %v4091_v5 = vadd.f32 %v1798_v55, %v4648_v30  ;;  %v4500_v58 = vmax.f32 %v4072_v31, 0.0  ;;  %v1761_v21 = vmul.f32 0.4054651, %v1697_v61  ;;  %v1795_v60 = vadd.f32 %v1779_v26, %v1763_v2  ;;  %v4658_v61 = vld [vmem:[#allocation23_spill] sm:$0xff] }
 0x5e2   :  { %v1771_v25 = vmul.f32 0.4054651, %v1722_v43  ;;  %v1692_v43 = vadd.f32 %v4002_v24, %v4016_v45  ;;  %v4501_v59 = vmax.f32 %v4080_v12, 0.0  ;;  %v1777_v19 = vmul.f32 0.5945349, %v1745_v40  ;;  %v4661_v40 = vld [vmem:[#allocation15_spill] sm:$0xff] }
 0x5e3   :  { %v1842_v41 = vpack.c.bf16 %v4499_v4, %v4500_v58  ;;  %v4650_v24 = vmax.f32 %v3810_v47, 0.0  ;;  %v1687_v50 = vadd.f32 %v3994_v54, %v4007_v17  ;;  %v4651_v33 = vmax.f32 %v3817_v38, 0.0  ;;  %v2945_v4 = vld [vmem:[%s4402_s5 + $0x18] sm:$0xff]  ;;  %v2943_v58 = vld [vmem:[%s4402_s5 + $0x8] sm:$0xff] }
 0x5e4   :  { %v1803_v36 = vadd.f32 %v1787_v3, %v1771_v25  ;;  %v4649_v3 = vmax.f32 %v3798_v15, 0.0  ;;  %v1743_v25 = vadd.f32 %v1727_v42, %v3527_v22  ;;  %v4502_v15 = vmax.f32 %v4091_v5, 0.0 }
 0x5e5   :  { %v4110_v45 = vadd.f32 %v4037_v49, %v4650_v24  ;;  %v1759_v13 = vmul.f32 0.4054651, %v1692_v43  ;;  %v1793_v18 = vadd.f32 %v1777_v19, %v1761_v21  ;;  %v4117_v27 = vadd.f32 %v1795_v60, %v4651_v33  ;;  %v4652_v49 = vld [vmem:[#allocation35_spill] sm:$0xff]  ;;  %v4663_v60 = vld [vmem:[#allocation18_spill] sm:$0xff]  ;;  %v4666_v19 = vld [vmem:[#allocation21_spill] sm:$0xff] }
 0x5e6   :  { %v4066_v35 = vadd.f32 %v1803_v36, %v4645_v16  ;;  %v4098_v39 = vadd.f32 %v1797_v23, %v4649_v3  ;;  %v1841_v47 = vpack.c.bf16 %v4501_v59, %v4502_v15  ;;  %v1741_v36 = vadd.f32 %v1725_v32, %v4652_v49  ;;  %v4656_v16 = vld [vmem:[#allocation20_spill] sm:$0xff]  ;;  %v4660_v23 = vld [vmem:[#allocation27_spill] sm:$0xff]  ;;  %v2942_v59 = vld [vmem:[%s4402_s5] sm:$0xff] }
 0x5e7   :  { %v1775_v11 = vmul.f32 0.5945349, %v1743_v25  ;;  %v4654_v10 = vmax.f32 %v4653_v34, 0.0  ;;  %v4504_v54 = vmax.f32 %v4110_v45, 0.0  ;;  %v1757_v38 = vmul.f32 0.4054651, %v1687_v50 }
 0x5e8   :  { %v4497_v28 = vmax.f32 %v4066_v35, 0.0  ;;  %v4503_v44 = vmax.f32 %v4098_v39, 0.0  ;;  %v4657_v20 = vmax.f32 %v4656_v16, 0.0  ;;  %v4505_v55 = vmax.f32 %v4117_v27, 0.0  ;;  %v4668_v33 = vld [vmem:[#allocation12_spill] sm:$0xff]  ;;  %v4671_v16 = vld [vmem:[#allocation22_spill] sm:$0xff] }
 0x5e9   :  { %v4128_v17 = vadd.f32 %v4655_v0, %v4654_v10  ;;  %v1791_v37 = vadd.f32 %v1775_v11, %v1759_v13  ;;  %v1773_v51 = vmul.f32 0.5945349, %v1741_v36  ;;  %v4659_v2 = vmax.f32 %v4658_v61, 0.0  ;;  %v4670_v36 = vld [vmem:[#allocation8_spill] sm:$0xff]  ;;  %v4675_v61 = vld [vmem:[#allocation10_spill] sm:$0xff] }
 0x5ea   :  { %v1843_v53 = vpack.c.bf16 %v4497_v28, %v4498_v14  ;;  %v4133_v8 = vadd.f32 %v1793_v18, %v4657_v20  ;;  %v1840_v48 = vpack.c.bf16 %v4503_v44, %v4504_v54  ;;  %v4662_v26 = vmax.f32 %v4661_v40, 0.0  ;;  %v4672_v20 = vld [vmem:[#allocation31_spill] sm:$0xff]  ;;  %v2144_v28 = vpop.f32.mrf.mxu0 }
 0x5eb   :  { %v4143_v63 = vadd.f32 %v4660_v23, %v4659_v2  ;;  %v1789_v42 = vadd.f32 %v1773_v51, %v1757_v38  ;;  %v4664_v3 = vmax.f32 %v4663_v60, 0.0  ;;  %v4667_v24 = vmax.f32 %v4666_v19, 0.0  ;;  %v4674_v51 = vld [vmem:[#allocation16_spill] sm:$0xff]  ;;  %v4676_v2 = vld [vmem:[#allocation29_spill] sm:$0xff]  ;;  %v2931_v40 = vld [vmem:[#allocation3 + $0x1a8] sm:$0xff] }
 0x5ec   :  { %1844 = vmatpush.bf16.msrb.mxu2 %v1843_v53  ;;  %v4506_v53 = vmax.f32 %v4128_v17, 0.0  ;;  %v4148_v30 = vadd.f32 %v1791_v37, %v4662_v26  ;;  %v4507_v21 = vmax.f32 %v4133_v8, 0.0  ;;  %v2933_v23 = vld [vmem:[#allocation3 + $0x1b8] sm:$0xff]  ;;  %v2930_v26 = vld [vmem:[#allocation3 + $0x1a0] sm:$0xff] }
 0x5ed   :  { %v4508_v25 = vmax.f32 %v4143_v63, 0.0  ;;  %v4163_v50 = vadd.f32 %v1789_v42, %v4667_v24  ;;  %2086 = vmatpush.bf16.msrb.mxu3 %v2933_v23  ;;  %v2932_v42 = vld [vmem:[#allocation3 + $0x1b0] sm:$0xff]  ;;  %v2929_v60 = vld [vmem:[#allocation3 + $0x198] sm:$0xff]  ;;  %v2926_v19 = vld [vmem:[#allocation3 + $0x180] sm:$0xff] }
 0x5ee   :  { %v1839_v43 = vpack.c.bf16 %v4505_v55, %v4506_v53  ;;  %v4509_v18 = vmax.f32 %v4148_v30, 0.0  ;;  %v4678_v24 = vld [vmem:[#allocation9_spill] sm:$0xff] }
 0x5ef   :  { %v1838_v13 = vpack.c.bf16 %v4507_v21, %v4508_v25  ;;  %v1821_v0 = vmax.f32 %v4163_v50, 0.0 }
 0x5f0   :  { %1845 = vmatpush.bf16.msrb.mxu2 %v1842_v41  ;;  %v4665_v41 = vld [vmem:[#allocation7_spill] sm:$0xff] }
 0x5f1   :  { %v4158_v32 = vadd.f32 %v4665_v41, %v4664_v3  ;;  %2087 = vmatpush.bf16.msrb.mxu3 %v2932_v42  ;;  %v2928_v3 = vld [vmem:[#allocation3 + $0x190] sm:$0xff]  ;;  %v2927_v41 = vld [vmem:[#allocation3 + $0x188] sm:$0xff] }
 0x5f3   :  { %v4510_v34 = vmax.f32 %v4158_v32, 0.0 }
 0x5f4   :  { %1846 = vmatpush.bf16.msrb.mxu2 %v1841_v47  ;;  %v4669_v47 = vmax.f32 %v4668_v33, 0.0 }
 0x5f5   :  { %v1837_v10 = vpack.c.bf16 %v4509_v18, %v4510_v34  ;;  %2088 = vmatpush.bf16.msrb.mxu3 %v2931_v40 }
 0x5f6   :  { %v4173_v11 = vadd.f32 %v4670_v36, %v4669_v47 }
 0x5f8   :  { %1847 = vmatpush.bf16.msrb.mxu2 %v1840_v48  ;;  %v1820_v38 = vmax.f32 %v4173_v11, 0.0  ;;  %v4673_v48 = vld [vmem:[#allocation11_spill] sm:$0xff] }
 0x5f9   :  { %2089 = vmatpush.bf16.msrb.mxu3 %v2930_v26 }
 0x5fa   :  { %v1836_v37 = vpack.c.bf16 %v1821_v0, %v1820_v38 }
 0x5fc   :  { %1848 = vmatpush.bf16.msrb.mxu2 %v1839_v43  ;;  %v4677_v43 = vld [vmem:[#allocation25_spill] sm:$0xff] }
 0x5fd   :  { %2090 = vmatpush.bf16.msrb.mxu3 %v2929_v60 }
 0x600   :  { %1849 = vmatpush.bf16.msrb.mxu2 %v1838_v13 }
 0x601   :  { %2091 = vmatpush.bf16.msrb.mxu3 %v2928_v3 }
 0x604   :  { %1850 = vmatpush.bf16.msrb.mxu2 %v1837_v10 }
 0x605   :  { %2092 = vmatpush.bf16.msrb.mxu3 %v2927_v41 }
 0x608   :  { %1851 = vmatpush.bf16.msrb.mxu2 %v1836_v37 }
 0x609   :  { %2093 = vmatpush.bf16.msrb.mxu3 %v2926_v19 }
 0x60b   :  { %1852 = vmatmul.bf16.vlgmr.msrb.gmra.mxu2 %v4671_v16 }
 0x61b   :  { %1857 = vmatmul.bf16.gmra.mxu2 %v4672_v20 }
 0x62b   :  { %1862 = vmatmul.bf16.gmra.mxu2 %v4673_v48 }
 0x63b   :  { %1867 = vmatmul.bf16.gmra.mxu2 %v4674_v51 }
 0x64b   :  { %1872 = vmatmul.bf16.gmra.mxu2 %v4675_v61 }
 0x65b   :  { %1877 = vmatmul.bf16.gmra.mxu2 %v4676_v2 }
 0x66b   :  { %1882 = vmatmul.bf16.gmra.mxu2 %v4677_v43 }
 0x67b   :  { %1887 = vmatmul.bf16.gmra.mxu2 %v4678_v24 }
 0x68e   :  { %v4194_v13 = vpop.f32.mrf.mxu2 }
 0x68f   :  { %v1893_v33 = vpack.c.bf16 %v4194_v13, %v4194_v13 }
 0x691   :  { %v1925_v10 = vunpack.c.l.b16 %v1893_v33 }
 0x696   :  { %v4198_v47 = vpop.f32.mrf.mxu2 }
 0x697   :  { %v1894_v36 = vpack.c.bf16 %v4198_v47, %v4198_v47 }
 0x699   :  { %v1926_v37 = vunpack.c.l.b16 %v1894_v36 }
 0x69b   :  { %v1941_v16 = vpack.c.b16 %v1926_v37, %v1925_v10 }
 0x69d   :  { %2094 = vmatmul.bf16.vlgmr.msrb.gmra.mxu3 %v1941_v16 }
 0x69e   :  { %v4202_v20 = vpop.f32.mrf.mxu2 }
 0x69f   :  { %v1895_v48 = vpack.c.bf16 %v4202_v20, %v4202_v20 }
 0x6a1   :  { %v1927_v2 = vunpack.c.l.b16 %v1895_v48 }
 0x6a6   :  { %v4206_v51 = vpop.f32.mrf.mxu2 }
 0x6a7   :  { %v1896_v61 = vpack.c.bf16 %v4206_v51, %v4206_v51 }
 0x6a9   :  { %v1928_v23 = vunpack.c.l.b16 %v1896_v61 }
 0x6ab   :  { %v1942_v42 = vpack.c.b16 %v1928_v23, %v1927_v2 }
 0x6ad   :  { %2099 = vmatmul.bf16.gmra.mxu3 %v1942_v42 }
 0x6ae   :  { %v4210_v40 = vpop.f32.mrf.mxu2 }
 0x6af   :  { %v1897_v26 = vpack.c.bf16 %v4210_v40, %v4210_v40 }
 0x6b1   :  { %v1929_v3 = vunpack.c.l.b16 %v1897_v26 }
 0x6b6   :  { %v4214_v43 = vpop.f32.mrf.mxu2 }
 0x6b7   :  { %v1898_v60 = vpack.c.bf16 %v4214_v43, %v4214_v43 }
 0x6b9   :  { %v1930_v41 = vunpack.c.l.b16 %v1898_v60 }
 0x6bb   :  { %v1943_v19 = vpack.c.b16 %v1930_v41, %v1929_v3 }
 0x6bd   :  { %2104 = vmatmul.bf16.gmra.mxu3 %v1943_v19 }
 0x6be   :  { %v4218_v24 = vpop.f32.mrf.mxu2 }
 0x6bf   :  { %v1899_v33 = vpack.c.bf16 %v4218_v24, %v4218_v24 }
 0x6c1   :  { %v1931_v37 = vunpack.c.l.b16 %v1899_v33 }
 0x6c6   :  { %v4222_v36 = vpop.f32.mrf.mxu2 }
 0x6c7   :  { %v1900_v10 = vpack.c.bf16 %v4222_v36, %v4222_v36 }
 0x6c9   :  { %v1932_v16 = vunpack.c.l.b16 %v1900_v10 }
 0x6cb   :  { %v1944_v48 = vpack.c.b16 %v1932_v16, %v1931_v37 }
 0x6cd   :  { %2109 = vmatmul.bf16.gmra.mxu3 %v1944_v48 }
 0x6ce   :  { %v4226_v61 = vpop.f32.mrf.mxu2 }
 0x6cf   :  { %v1901_v2 = vpack.c.bf16 %v4226_v61, %v4226_v61 }
 0x6d1   :  { %v1933_v26 = vunpack.c.l.b16 %v1901_v2  ;;  %v2949_v2 = vld [vmem:[%s4402_s5 + $0x38] sm:$0xff] }
 0x6d2   :  { %2372 = vmatpush.bf16.msrb.mxu1 %v2949_v2 }
 0x6d6   :  { %v4230_v23 = vpop.f32.mrf.mxu2 }
 0x6d7   :  { %v1902_v42 = vpack.c.bf16 %v4230_v23, %v4230_v23 }
 0x6d9   :  { %v1934_v60 = vunpack.c.l.b16 %v1902_v42 }
 0x6db   :  { %v1945_v3 = vpack.c.b16 %v1934_v60, %v1933_v26  ;;  %v2948_v26 = vld [vmem:[%s4402_s5 + $0x30] sm:$0xff]  ;;  %v2947_v60 = vld [vmem:[%s4402_s5 + $0x28] sm:$0xff] }
 0x6dc   :  { %2373 = vmatpush.bf16.msrb.mxu1 %v2948_v26  ;;  %v2946_v26 = vld [vmem:[%s4402_s5 + $0x20] sm:$0xff] }
 0x6dd   :  { %2114 = vmatmul.bf16.gmra.mxu3 %v1945_v3 }
 0x6de   :  { %v4234_v41 = vpop.f32.mrf.mxu2 }
 0x6df   :  { %v1903_v19 = vpack.c.bf16 %v4234_v41, %v4234_v41 }
 0x6e0   :  { %2374 = vmatpush.bf16.msrb.mxu1 %v2947_v60 }
 0x6e1   :  { %v1935_v37 = vunpack.c.l.b16 %v1903_v19 }
 0x6e4   :  { %2375 = vmatpush.bf16.msrb.mxu1 %v2946_v26  ;;  %v2146_v26 = vpop.f32.mrf.mxu0 }
 0x6e6   :  { %v4238_v33 = vpop.f32.mrf.mxu2 }
 0x6e7   :  { %v1904_v10 = vpack.c.bf16 %v4238_v33, %v4238_v33 }
 0x6e8   :  { %2376 = vmatpush.bf16.msrb.mxu1 %v2945_v4  ;;  %v2184_v4 = vmul.f32 0.3, %v4194_v13 }
 0x6e9   :  { %v1936_v16 = vunpack.c.l.b16 %v1904_v10 }
 0x6eb   :  { %v1946_v48 = vpack.c.b16 %v1936_v16, %v1935_v37 }
 0x6ed   :  { %2119 = vmatmul.bf16.gmra.mxu3 %v1946_v48 }
 0x6ee   :  { %v4245_v42 = vpop.f32.mrf.mxu2 }
 0x6ef   :  { %v1905_v3 = vpack.c.bf16 %v4245_v42, %v4245_v42 }
 0x6f1   :  { %v1937_v37 = vunpack.c.l.b16 %v1905_v3 }
 0x6f6   :  { %v4255_v19 = vpop.f32.mrf.mxu2 }
 0x6f7   :  { %v1906_v10 = vpack.c.bf16 %v4255_v19, %v4255_v19 }
 0x6f9   :  { %v1938_v16 = vunpack.c.l.b16 %v1906_v10 }
 0x6fb   :  { %v1947_v48 = vpack.c.b16 %v1938_v16, %v1937_v37  ;;  %v2944_v16 = vld [vmem:[%s4402_s5 + $0x10] sm:$0xff] }
 0x6fc   :  { %2377 = vmatpush.bf16.msrb.mxu1 %v2944_v16  ;;  %v2185_v16 = vmul.f32 0.3, %v4198_v47 }
 0x6fd   :  { %2124 = vmatmul.bf16.gmra.mxu3 %v1947_v48 }
 0x6fe   :  { %v4259_v2 = vpop.f32.mrf.mxu2  ;;  %v2201_v55 = vadd.f32 %v2185_v16, %v4652_v49  ;;  %v4680_v49 = vld [vmem:[#allocation26_spill] sm:$0xff] }
 0x6ff   :  { %v1907_v14 = vpack.c.bf16 %v4259_v2, %v4259_v2 }
 0x700   :  { %2378 = vmatpush.bf16.msrb.mxu1 %v2943_v58  ;;  %v2233_v18 = vmul.f32 0.6815463, %v2201_v55 }
 0x701   :  { %v1939_v10 = vunpack.c.l.b16 %v1907_v14  ;;  %v2149_v14 = vpop.f32.mrf.mxu0 }
 0x704   :  { %2379 = vmatpush.bf16.msrb.mxu1 %v2942_v59 }
 0x706   :  { %v4269_v60 = vpop.f32.mrf.mxu2 }
 0x707   :  { %v1908_v3 = vpack.c.bf16 %v4269_v60, %v4269_v60 }
 0x709   :  { %v1940_v37 = vunpack.c.l.b16 %v1908_v3  ;;  %v2151_v3 = vpop.f32.mrf.mxu0 }
 0x70b   :  { %v1948_v48 = vpack.c.b16 %v1940_v37, %v1939_v10  ;;  %v4679_v10 = vld [vmem:[#allocation24_spill] sm:$0xff] }
 0x70c   :  { %v2200_v37 = vadd.f32 %v2184_v4, %v4679_v10 }
 0x70d   :  { %2129 = vmatmul.bf16.gmra.mxu3 %v1948_v48 }
 0x70e   :  { %v2232_v54 = vmul.f32 0.6815463, %v2200_v37 }
 0x711   :  { %v2154_v25 = vpop.f32.mrf.mxu0 }
 0x719   :  { %v2156_v55 = vpop.f32.mrf.mxu0 }
 0x720   :  { %v2095_v15 = vpop.f32.mrf.mxu3 }
 0x721   :  { %v2145_v44 = vadd.f32 %v2144_v28, %v2095_v15  ;;  %v2186_v28 = vmul.f32 0.3, %v4202_v20 }
 0x723   :  { %v2216_v48 = vmul.f32 0.31845373, %v2145_v44  ;;  %v2202_v37 = vadd.f32 %v2186_v28, %v4680_v49 }
 0x725   :  { %v2248_v53 = vadd.f32 %v2232_v54, %v2216_v48  ;;  %v2187_v54 = vmul.f32 0.3, %v4206_v51  ;;  %v2234_v11 = vmul.f32 0.6815463, %v2202_v37  ;;  %v2159_v48 = vpop.f32.mrf.mxu0  ;;  %v4682_v51 = vmax.f32 %v4148_v30, 0.0 }
 0x727   :  { %v2264_v13 = vadd.f32 %v2248_v53, %v1820_v38  ;;  %v2203_v53 = vadd.f32 %v2187_v54, %v3527_v22  ;;  %v4683_v22 = vld [vmem:[#allocation28_spill] sm:$0xff] }
 0x728   :  { %v2097_v58 = vpop.f32.mrf.mxu3 }
 0x729   :  { %v2147_v21 = vadd.f32 %v2146_v26, %v2097_v58  ;;  %v2280_v44 = vmax.f32 %v2264_v13, 0.0  ;;  %v2235_v50 = vmul.f32 0.6815463, %v2203_v53  ;;  %v2188_v58 = vmul.f32 0.3, %v4210_v40 }
 0x72b   :  { %v2217_v59 = vmul.f32 0.31845373, %v2147_v21 }
 0x72d   :  { %v2249_v34 = vadd.f32 %v2233_v18, %v2217_v59  ;;  %v2161_v37 = vpop.f32.mrf.mxu0 }
 0x72f   :  { %v2265_v15 = vadd.f32 %v2249_v34, %v1821_v0  ;;  %v4681_v0 = vmax.f32 %v4158_v32, 0.0 }
 0x730   :  { %v2100_v47 = vpop.f32.mrf.mxu3 }
 0x731   :  { %v2281_v4 = vmax.f32 %v2265_v15, 0.0  ;;  %v2150_v10 = vadd.f32 %v2149_v14, %v2100_v47 }
 0x733   :  { %v2296_v26 = vpack.c.bf16 %v2281_v4, %v2280_v44  ;;  %v2218_v21 = vmul.f32 0.31845373, %v2150_v10  ;;  %v2204_v44 = vadd.f32 %v2188_v58, %v4683_v22  ;;  %v4687_v22 = vmax.f32 %v4128_v17, 0.0 }
 0x735   :  { %2380 = vmatmul.bf16.vlgmr.msrb.gmra.mxu1 %v2296_v26  ;;  %v2250_v38 = vadd.f32 %v2234_v11, %v2218_v21  ;;  %v2236_v32 = vmul.f32 0.6815463, %v2204_v44  ;;  %v4684_v11 = vmax.f32 %v4143_v63, 0.0 }
 0x737   :  { %v2266_v16 = vadd.f32 %v2250_v38, %v4681_v0 }
 0x738   :  { %v2102_v18 = vpop.f32.mrf.mxu3 }
 0x739   :  { %v2152_v20 = vadd.f32 %v2151_v3, %v2102_v18  ;;  %v2282_v28 = vmax.f32 %v2266_v16, 0.0  ;;  %v2189_v3 = vmul.f32 0.3, %v4214_v43  ;;  %v2190_v18 = vmul.f32 0.3, %v4218_v24  ;;  %v4686_v16 = vld [vmem:[#allocation30_spill] sm:$0xff] }
 0x73a   :  { %v4685_v43 = vmax.f32 %v4133_v8, 0.0 }
 0x73b   :  { %v2219_v34 = vmul.f32 0.31845373, %v2152_v20  ;;  %v2205_v49 = vadd.f32 %v2189_v3, %v3508_v1  ;;  %v2164_v1 = vpop.f32.mrf.mxu0  ;;  %v2192_v3 = vmul.f32 0.3, %v4226_v61 }
 0x73d   :  { %v2251_v14 = vadd.f32 %v2235_v50, %v2219_v34  ;;  %v2237_v30 = vmul.f32 0.6815463, %v2205_v49 }
 0x73f   :  { %v2267_v59 = vadd.f32 %v2251_v14, %v4682_v51  ;;  %v2206_v14 = vadd.f32 %v2190_v18, %v4686_v16 }
 0x740   :  { %v2105_v13 = vpop.f32.mrf.mxu3 }
 0x741   :  { %v2283_v15 = vmax.f32 %v2267_v59, 0.0  ;;  %v2155_v47 = vadd.f32 %v2154_v25, %v2105_v13  ;;  %v2238_v63 = vmul.f32 0.6815463, %v2206_v14 }
 0x743   :  { %v2297_v4 = vpack.c.bf16 %v2283_v15, %v2282_v28  ;;  %v2220_v10 = vmul.f32 0.31845373, %v2155_v47  ;;  %v2166_v47 = vpop.f32.mrf.mxu0 }
 0x745   :  { %2385 = vmatmul.bf16.gmra.mxu1 %v2297_v4  ;;  %v2252_v40 = vadd.f32 %v2236_v32, %v2220_v10 }
 0x747   :  { %v2268_v53 = vadd.f32 %v2252_v40, %v4684_v11 }
 0x748   :  { %v2107_v54 = vpop.f32.mrf.mxu3 }
 0x749   :  { %v2157_v26 = vadd.f32 %v2156_v55, %v2107_v54  ;;  %v2284_v50 = vmax.f32 %v2268_v53, 0.0  ;;  %v2191_v55 = vmul.f32 0.3, %v4222_v36  ;;  %v4688_v36 = vmax.f32 %v4117_v27, 0.0 }
 0x74b   :  { %v2221_v21 = vmul.f32 0.31845373, %v2157_v26  ;;  %v2207_v59 = vadd.f32 %v2191_v55, %v3490_v52  ;;  %v4689_v52 = vld [vmem:[#allocation32_spill] sm:$0xff] }
 0x74c   :  { %v2208_v40 = vadd.f32 %v2192_v3, %v4689_v52 }
 0x74d   :  { %v2253_v25 = vadd.f32 %v2237_v30, %v2221_v21  ;;  %v2239_v8 = vmul.f32 0.6815463, %v2207_v59  ;;  %v2169_v21 = vpop.f32.mrf.mxu0 }
 0x74e   :  { %v2240_v17 = vmul.f32 0.6815463, %v2208_v40 }
 0x74f   :  { %v2269_v38 = vadd.f32 %v2253_v25, %v4685_v43  ;;  %v4690_v43 = vmax.f32 %v4110_v45, 0.0 }
 0x750   :  { %v2110_v20 = vpop.f32.mrf.mxu3 }
 0x751   :  { %v2285_v34 = vmax.f32 %v2269_v38, 0.0  ;;  %v2160_v0 = vadd.f32 %v2159_v48, %v2110_v20 }
 0x753   :  { %v2298_v58 = vpack.c.bf16 %v2285_v34, %v2284_v50  ;;  %v2222_v51 = vmul.f32 0.31845373, %v2160_v0  ;;  %v2194_v50 = vmul.f32 0.3, %v4234_v41 }
 0x755   :  { %2390 = vmatmul.bf16.gmra.mxu1 %v2298_v58  ;;  %v2254_v24 = vadd.f32 %v2238_v63, %v2222_v51  ;;  %v2171_v0 = vpop.f32.mrf.mxu0  ;;  %v2195_v58 = vmul.f32 0.3, %v4238_v33  ;;  %v4693_v33 = vmax.f32 %v4080_v12, 0.0 }
 0x757   :  { %v2270_v48 = vadd.f32 %v2254_v24, %v4687_v22  ;;  %v2211_v59 = vadd.f32 %v2195_v58, %v3469_v7  ;;  %v4698_v58 = vmax.f32 %v4066_v35, 0.0 }
 0x758   :  { %v2112_v13 = vpop.f32.mrf.mxu3 }
 0x759   :  { %v2162_v28 = vadd.f32 %v2161_v37, %v2112_v13  ;;  %v2286_v32 = vmax.f32 %v2270_v48, 0.0  ;;  %v2193_v37 = vmul.f32 0.3, %v4230_v23  ;;  %v4691_v23 = vmax.f32 %v4098_v39, 0.0 }
 0x75b   :  { %v2223_v15 = vmul.f32 0.31845373, %v2162_v28  ;;  %v2209_v11 = vadd.f32 %v2193_v37, %v3480_v29  ;;  %v2210_v29 = vadd.f32 %v2194_v50, %v3475_v56  ;;  %v2243_v28 = vmul.f32 0.6815463, %v2211_v59 }
 0x75c   :  { %v2196_v56 = vmul.f32 0.3, %v4245_v42 }
 0x75d   :  { %v2255_v44 = vadd.f32 %v2239_v8, %v2223_v15  ;;  %v2241_v27 = vmul.f32 0.6815463, %v2209_v11  ;;  %v2242_v45 = vmul.f32 0.6815463, %v2210_v29  ;;  %v2174_v39 = vpop.f32.mrf.mxu0  ;;  %v4692_v15 = vmax.f32 %v4091_v5, 0.0 }
 0x75e   :  { %v2212_v7 = vadd.f32 %v2196_v56, %v4642_v9  ;;  %v2198_v9 = vmul.f32 0.3, %v4259_v2 }
 0x75f   :  { %v2271_v4 = vadd.f32 %v2255_v44, %v4688_v36 }
 0x760   :  { %v2115_v10 = vpop.f32.mrf.mxu3  ;;  %v2244_v5 = vmul.f32 0.6815463, %v2212_v7 }
 0x761   :  { %v2287_v49 = vmax.f32 %v2271_v4, 0.0  ;;  %v2165_v54 = vadd.f32 %v2164_v1, %v2115_v10  ;;  %v2197_v10 = vmul.f32 0.3, %v4255_v19  ;;  %v4695_v19 = vmax.f32 %v4062_v46, 0.0 }
 0x763   :  { %v2299_v26 = vpack.c.bf16 %v2287_v49, %v2286_v32  ;;  %v2224_v30 = vmul.f32 0.31845373, %v2165_v54  ;;  %v2213_v52 = vadd.f32 %v2197_v10, %v3459_v57  ;;  %v4696_v57 = vld [vmem:[#allocation33_spill] sm:$0xff] }
 0x765   :  { %2395 = vmatmul.bf16.gmra.mxu1 %v2299_v26  ;;  %v2256_v61 = vadd.f32 %v2240_v17, %v2224_v30  ;;  %v2176_v49 = vpop.f32.mrf.mxu0  ;;  %v2245_v12 = vmul.f32 0.6815463, %v2213_v52  ;;  %v4694_v30 = vmax.f32 %v4072_v31, 0.0 }
 0x767   :  { %v2272_v38 = vadd.f32 %v2256_v61, %v4690_v43  ;;  %v2214_v43 = vadd.f32 %v2198_v9, %v4696_v57 }
 0x768   :  { %v2117_v53 = vpop.f32.mrf.mxu3 }
 0x769   :  { %v2167_v25 = vadd.f32 %v2166_v47, %v2117_v53  ;;  %v2288_v16 = vmax.f32 %v2272_v38, 0.0  ;;  %v2199_v38 = vmul.f32 0.3, %v4269_v60  ;;  %v2246_v31 = vmul.f32 0.6815463, %v2214_v43 }
 0x76b   :  { %v2225_v18 = vmul.f32 0.31845373, %v2167_v25 }
 0x76d   :  { %v2257_v20 = vadd.f32 %v2241_v27, %v2225_v18  ;;  %v2179_v11 = vpop.f32.mrf.mxu0 }
 0x76f   :  { %v2273_v34 = vadd.f32 %v2257_v20, %v4691_v23  ;;  %v2215_v23 = vadd.f32 %v2199_v38, %v3467_v6  ;;  %v3013_v6 = vld [vmem:[%s4403_s6] ss:$0 sm:$0xff] }
 0x770   :  { %v2120_v1 = vpop.f32.mrf.mxu3 }
 0x771   :  { %v2289_v14 = vmax.f32 %v2273_v34, 0.0  ;;  %v2170_v55 = vadd.f32 %v2169_v21, %v2120_v1  ;;  %v2247_v46 = vmul.f32 0.6815463, %v2215_v23 }
 0x773   :  { %v2300_v51 = vpack.c.bf16 %v2289_v14, %v2288_v16  ;;  %v2226_v63 = vmul.f32 0.31845373, %v2170_v55  ;;  %v4697_v14 = vmax.f32 %v4056_v62, 0.0 }
 0x775   :  { %2400 = vmatmul.bf16.gmra.mxu1 %v2300_v51  ;;  %v2258_v41 = vadd.f32 %v2242_v45, %v2226_v63  ;;  %v2181_v34 = vpop.f32.mrf.mxu0 }
 0x777   :  { %v2274_v47 = vadd.f32 %v2258_v41, %v4692_v15 }
 0x778   :  { %v2122_v13 = vpop.f32.mrf.mxu3 }
 0x779   :  { %v2172_v24 = vadd.f32 %v2171_v0, %v2122_v13  ;;  %v2290_v3 = vmax.f32 %v2274_v47, 0.0 }
 0x77b   :  { %v2227_v8 = vmul.f32 0.31845373, %v2172_v24 }
 0x77d   :  { %v2259_v22 = vadd.f32 %v2243_v28, %v2227_v8 }
 0x77f   :  { %v2275_v48 = vadd.f32 %v2259_v22, %v4693_v33 }
 0x780   :  { %v2125_v44 = vpop.f32.mrf.mxu3 }
 0x781   :  { %v2291_v36 = vmax.f32 %v2275_v48, 0.0  ;;  %v2175_v4 = vadd.f32 %v2174_v39, %v2125_v44 }
 0x783   :  { %v2301_v32 = vpack.c.bf16 %v2291_v36, %v2290_v3  ;;  %v2228_v54 = vmul.f32 0.31845373, %v2175_v4 }
 0x785   :  { %2405 = vmatmul.bf16.gmra.mxu1 %v2301_v32  ;;  %v2260_v42 = vadd.f32 %v2244_v5, %v2228_v54 }
 0x787   :  { %v2276_v21 = vadd.f32 %v2260_v42, %v4694_v30 }
 0x788   :  { %v2127_v40 = vpop.f32.mrf.mxu3 }
 0x789   :  { %v2177_v37 = vadd.f32 %v2176_v49, %v2127_v40  ;;  %v2292_v25 = vmax.f32 %v2276_v21, 0.0 }
 0x78b   :  { %v2229_v26 = vmul.f32 0.31845373, %v2177_v37 }
 0x78d   :  { %v2261_v17 = vadd.f32 %v2245_v12, %v2229_v26 }
 0x78f   :  { %v2277_v53 = vadd.f32 %v2261_v17, %v4695_v19 }
 0x790   :  { %v2130_v61 = vpop.f32.mrf.mxu3 }
 0x791   :  { %v2293_v27 = vmax.f32 %v2277_v53, 0.0  ;;  %v2180_v18 = vadd.f32 %v2179_v11, %v2130_v61 }
 0x793   :  { %v2302_v20 = vpack.c.bf16 %v2293_v27, %v2292_v25  ;;  %v2230_v50 = vmul.f32 0.31845373, %v2180_v18 }
 0x795   :  { %2410 = vmatmul.bf16.gmra.mxu1 %v2302_v20  ;;  %v2262_v2 = vadd.f32 %v2246_v31, %v2230_v50 }
 0x797   :  { %v2278_v55 = vadd.f32 %v2262_v2, %v4697_v14 }
 0x798   :  { %v2132_v0 = vpop.f32.mrf.mxu3 }
 0x799   :  { %v2182_v1 = vadd.f32 %v2181_v34, %v2132_v0  ;;  %v2294_v60 = vmax.f32 %v2278_v55, 0.0 }
 0x79b   :  { %v2231_v16 = vmul.f32 0.31845373, %v2182_v1 }
 0x79d   :  { %v2263_v29 = vadd.f32 %v2247_v46, %v2231_v16 }
 0x79f   :  { %v2279_v51 = vadd.f32 %v2263_v29, %v4698_v58 }
 0x7a1   :  { %v2295_v63 = vmax.f32 %v2279_v51, 0.0 }
 0x7a3   :  { %v2303_v45 = vpack.c.bf16 %v2295_v63, %v2294_v60 }
 0x7a5   :  { %2415 = vmatmul.bf16.gmra.mxu1 %v2303_v45 }
 0x7b2   :  { %v2381_v59 = vpop.f32.mrf.mxu1 }
 0x7b3   :  { %v2382_v13 = vadd.f32 %v3013_v6, %v2381_v59 }
 0x7b5   :  { %2421 = vst [vmem:[%s4404_s7] sm:$0xff] %v2382_v13 }
 0x7ba   :  { %v2383_v62 = vpop.f32.mrf.mxu1 }
 0x7bb   :  { %v2384_v41 = vadd.f32 %v3013_v6, %v2383_v62 }
 0x7bd   :  { %2422 = vst [vmem:[%s4404_s7 + $0x8] sm:$0xff] %v2384_v41 }
 0x7c2   :  { %v2386_v35 = vpop.f32.mrf.mxu1 }
 0x7c3   :  { %v2387_v24 = vadd.f32 %v3013_v6, %v2386_v35 }
 0x7c5   :  { %2423 = vst [vmem:[%s4404_s7 + $0x10] sm:$0xff] %v2387_v24 }
 0x7ca   :  { %v2388_v39 = vpop.f32.mrf.mxu1 }
 0x7cb   :  { %v2389_v28 = vadd.f32 %v3013_v6, %v2388_v39 }
 0x7cd   :  { %2424 = vst [vmem:[%s4404_s7 + $0x18] sm:$0xff] %v2389_v28 }
 0x7d2   :  { %v2391_v8 = vpop.f32.mrf.mxu1 }
 0x7d3   :  { %v2392_v15 = vadd.f32 %v3013_v6, %v2391_v8 }
 0x7d5   :  { %2425 = vst [vmem:[%s4404_s7 + $0x20] sm:$0xff] %v2392_v15 }
 0x7da   :  { %v2393_v47 = vpop.f32.mrf.mxu1 }
 0x7db   :  { %v2394_v22 = vadd.f32 %v3013_v6, %v2393_v47 }
 0x7dd   :  { %2426 = vst [vmem:[%s4404_s7 + $0x28] sm:$0xff] %v2394_v22 }
 0x7e2   :  { %v2396_v56 = vpop.f32.mrf.mxu1 }
 0x7e3   :  { %v2397_v33 = vadd.f32 %v3013_v6, %v2396_v56 }
 0x7e5   :  { %2427 = vst [vmem:[%s4404_s7 + $0x30] sm:$0xff] %v2397_v33 }
 0x7ea   :  { %v2398_v48 = vpop.f32.mrf.mxu1 }
 0x7eb   :  { %v2399_v44 = vadd.f32 %v3013_v6, %v2398_v48 }
 0x7ed   :  { %2428 = vst [vmem:[%s4404_s7 + $0x38] sm:$0xff] %v2399_v44 }
 0x7f2   :  { %v2401_v3 = vpop.f32.mrf.mxu1 }
 0x7f3   :  { %v2402_v36 = vadd.f32 %v3013_v6, %v2401_v3 }
 0x7f5   :  { %2429 = vst [vmem:[%s4404_s7 + $0x40] sm:$0xff] %v2402_v36 }
 0x7fa   :  { %v2403_v4 = vpop.f32.mrf.mxu1 }
 0x7fb   :  { %v2404_v7 = vadd.f32 %v3013_v6, %v2403_v4 }
 0x7fd   :  { %2430 = vst [vmem:[%s4404_s7 + $0x48] sm:$0xff] %v2404_v7 }
 0x802   :  { %v2406_v10 = vpop.f32.mrf.mxu1 }
 0x803   :  { %v2407_v32 = vadd.f32 %v3013_v6, %v2406_v10 }
 0x805   :  { %2431 = vst [vmem:[%s4404_s7 + $0x50] sm:$0xff] %v2407_v32 }
 0x80a   :  { %v2408_v49 = vpop.f32.mrf.mxu1 }
 0x80b   :  { %v2409_v54 = vadd.f32 %v3013_v6, %v2408_v49 }
 0x80d   :  { %2432 = vst [vmem:[%s4404_s7 + $0x58] sm:$0xff] %v2409_v54 }
 0x812   :  { %v2411_v5 = vpop.f32.mrf.mxu1 }
 0x813   :  { %v2412_v52 = vadd.f32 %v3013_v6, %v2411_v5 }
 0x815   :  { %2433 = vst [vmem:[%s4404_s7 + $0x60] sm:$0xff] %v2412_v52 }
 0x81a   :  { %v2413_v40 = vpop.f32.mrf.mxu1 }
 0x81b   :  { %v2414_v42 = vadd.f32 %v3013_v6, %v2413_v40 }
 0x81d   :  { %2434 = vst [vmem:[%s4404_s7 + $0x68] sm:$0xff] %v2414_v42 }
 0x822   :  { %v2416_v37 = vpop.f32.mrf.mxu1 }
 0x823   :  { %v2417_v12 = vadd.f32 %v3013_v6, %v2416_v37 }
 0x825   :  { %2435 = vst [vmem:[%s4404_s7 + $0x70] sm:$0xff] %v2417_v12 }
 0x82a   :  { %v2418_v26 = vpop.f32.mrf.mxu1 }
 0x82b   :  { %v2419_v30 = vadd.f32 %v3013_v6, %v2418_v26 }
 0x82d   :  { %2436 = vst [vmem:[%s4404_s7 + $0x78] sm:$0xff] %v2419_v30 }
 0x82e   :  { %2441 = vsyncpa [#allocation4], 1 }

</bundles_post_ra>
